<compile_context>
chip_gen: v7x
topology: tpu7x:2x2x1
jax: 0.10.0
libtpu: 0.0.40
codegen_flags: <defaults>
</compile_context>

<pallas_src>
import functools

import jax
import jax.numpy as jnp
from jax import lax
from jax.experimental import pallas as pl
from jax.experimental.pallas import tpu as pltpu


def lstm_kernel(x_ref, wih0_ref, whh0_ref, b0_ref,
                wihr_ref, whhr_ref, br_ref, wfc_ref, bfc_ref,
                out_ref, xg_ref, *, seq_len, batch, num_rest):
    """Whole LSTM forward in one kernel invocation.

    x_ref   : (T*Bp, D)   bf16  time-major, batch-padded, flattened
    wih0_ref: (D, 4H)     bf16  layer-0 input weights (transposed, g cols x2)
    whh0_ref: (H, 4H)     bf16  layer-0 recurrent weights (transposed, g cols x2)
    b0_ref  : (1, 4H)     f32   layer-0 combined bias (b_ih + b_hh, g slice x2)
    wihr_ref: (R, H, 4H)  bf16  layers>=1 W_ih^T   (R = max(L-1, 1))
    whhr_ref: (R, H, 4H)  bf16  layers>=1 W_hh^T
    br_ref  : (R, 1, 4H)  f32   layers>=1 combined bias
    wfc_ref : (H, O) f32, bfc_ref: (1, O) f32
    out_ref : (Bp, O) f32
    xg_ref  : (T*Bp, 4H)  f32   VMEM scratch: hoisted layer-0 input projection
    """
    T, Bp = seq_len, batch
    H = whh0_ref.shape[0]

    # ---- Pre-pass (off the serial path): layer-0 input projection for ALL
    # timesteps as one tall bf16 MXU matmul, bias folded in.
    xg_ref[...] = (jnp.dot(x_ref[...], wih0_ref[...],
                           preferred_element_type=jnp.float32)
                   + b0_ref[...])

    # Loop-invariant weights.  L is small here, keep them resident; for large
    # L read wihr_ref[l] / whhr_ref[l] inside the loop instead (cheap vld)
    # to avoid vreg spill churn.
    whh0 = whh0_ref[...]
    wihr = [wihr_ref[l] for l in range(num_rest)]
    whhr = [whhr_ref[l] for l in range(num_rest)]
    br = [br_ref[l] for l in range(num_rest)]

    # Per-lane fixup constants (hoisted out of the loop): g-gate columns were
    # pre-scaled by 2 in the wrapper, so sigmoid over the whole (Bp, 4H) vreg
    # followed by (2*y - 1) on the g lanes gives tanh(x) there and sigmoid(x)
    # on the i/f/o lanes.
    lane = lax.broadcasted_iota(jnp.int32, (Bp, 4 * H), 1)
    g_mask = (lane >= 2 * H) & (lane < 3 * H)
    gscale = jnp.where(g_mask, 2.0, 1.0).astype(jnp.float32)
    gbias = jnp.where(g_mask, -1.0, 0.0).astype(jnp.float32)

    def gates_to_hc(gates, c_prev):
        y = jax.nn.sigmoid(gates)          # one full-vreg EUP push per cell
        act = y * gscale + gbias           # VPU fixup: g lanes -> tanh(x)
        i_g = act[:, 0 * H:1 * H]
        f_g = act[:, 1 * H:2 * H]
        g_g = act[:, 2 * H:3 * H]
        o_g = act[:, 3 * H:4 * H]
        c_new = f_g * c_prev + i_g * g_g
        h_new = o_g * jnp.tanh(c_new)
        return h_new, c_new

    def step(t, carry):
        hs, cs = carry
        row = pl.multiple_of(t * Bp, Bp)

        # All recurrent (h_prev @ W_hh) dots issue at the top of the step:
        # h_prev from iteration t-1 is already available, so these overlap
        # with the per-layer wavefront (no concat on the serial chain).
        rec = [jnp.dot(hs[l].astype(jnp.bfloat16),
                       whh0 if l == 0 else whhr[l - 1],
                       preferred_element_type=jnp.float32)
               for l in range(num_rest + 1)]

        # Layer 0: input projection was hoisted into xg.
        gates0 = xg_ref[pl.ds(row, Bp), :] + rec[0]
        h_new, c_new = gates_to_hc(gates0, cs[0])
        new_hs, new_cs = [h_new], [c_new]
        layer_in = h_new

        # Layers 1..L-1.
        for l in range(num_rest):
            gates = (jnp.dot(layer_in.astype(jnp.bfloat16), wihr[l],
                             preferred_element_type=jnp.float32)
                     + rec[l + 1] + br[l])
            h_new, c_new = gates_to_hc(gates, cs[l + 1])
            new_hs.append(h_new)
            new_cs.append(c_new)
            layer_in = h_new
        return tuple(new_hs), tuple(new_cs)

    n_layers = num_rest + 1
    h_init = tuple(jnp.zeros((Bp, H), jnp.float32) for _ in range(n_layers))
    c_init = tuple(jnp.zeros((Bp, H), jnp.float32) for _ in range(n_layers))
    hs, _ = lax.fori_loop(0, T, step, (h_init, c_init), unroll=min(T, 8))

    # Final linear layer on the last timestep's top-layer hidden state.
    out_ref[...] = (jnp.dot(hs[n_layers - 1], wfc_ref[...],
                            preferred_element_type=jnp.float32)
                    + bfc_ref[...])


def lstm_model_forward(x, params, hidden_dim, layer_dim, output_dim):
    """x: (B, T, D) float32, batch_first (same as the PyTorch module)."""
    B, T, D = x.shape
    H, L, O = hidden_dim, layer_dim, output_dim
    Bp = ((B + 7) // 8) * 8                                   # pad batch to sublanes

    def scale_g(w):
        # Pre-scale the g-gate block by 2 so tanh(x) = 2*sigmoid(2x) - 1
        # can be recovered from a single full-vreg sigmoid in the kernel.
        return w.at[..., 2 * H:3 * H].multiply(2.0)

    x_tbd = jnp.transpose(x, (1, 0, 2)).astype(jnp.float32)   # (T, B, D)
    x_pad = jnp.pad(x_tbd, ((0, 0), (0, Bp - B), (0, 0)))     # (T, Bp, D)
    x_flat = x_pad.reshape(T * Bp, D).astype(jnp.bfloat16)    # time-major rows

    # Glue: pre-transpose / pre-scale / cast weights outside the kernel.
    wih0_t = scale_g(params["w_ih_l0"].T).astype(jnp.bfloat16)          # (D, 4H)
    whh0_t = scale_g(params["w_hh_l0"].T).astype(jnp.bfloat16)          # (H, 4H)
    b0 = scale_g(params["b_ih_l0"] + params["b_hh_l0"])[None, :]        # (1, 4H) f32
    b0 = b0.astype(jnp.float32)

    n_rest = L - 1
    r_pad = max(n_rest, 1)                                    # dummy slot when L == 1
    if n_rest >= 1:
        wihr = jnp.stack([scale_g(params[f"w_ih_l{l}"].T) for l in range(1, L)])
        whhr = jnp.stack([scale_g(params[f"w_hh_l{l}"].T) for l in range(1, L)])
        br = jnp.stack([scale_g(params[f"b_ih_l{l}"] + params[f"b_hh_l{l}"])[None, :]
                        for l in range(1, L)])
    else:
        wihr = jnp.zeros((1, H, 4 * H), jnp.float32)          # never read in-kernel
        whhr = jnp.zeros((1, H, 4 * H), jnp.float32)
        br = jnp.zeros((1, 1, 4 * H), jnp.float32)
    wihr = wihr.astype(jnp.bfloat16)                          # (R, H, 4H)
    whhr = whhr.astype(jnp.bfloat16)                          # (R, H, 4H)
    br = br.astype(jnp.float32)                               # (R, 1, 4H)

    wfc_t = params["fc_w"].T.astype(jnp.float32)              # (H, O)
    bfc = params["fc_b"][None, :].astype(jnp.float32)         # (1, O)

    def full(shape):
        n = len(shape)
        return pl.BlockSpec(shape, lambda i, _n=n: (0,) * _n)

    grid_spec = pltpu.PrefetchScalarGridSpec(
        num_scalar_prefetch=0,
        grid=(1,),                                            # single invocation
        in_specs=[
            full((T * Bp, D)),
            full((D, 4 * H)),
            full((H, 4 * H)),
            full((1, 4 * H)),
            full((r_pad, H, 4 * H)),
            full((r_pad, H, 4 * H)),
            full((r_pad, 1, 4 * H)),
            full((H, O)),
            full((1, O)),
        ],
        out_specs=pl.BlockSpec((Bp, O), lambda i: (0, 0)),
        scratch_shapes=[pltpu.VMEM((T * Bp, 4 * H), jnp.float32)],
    )

    out_pad = pl.pallas_call(
        functools.partial(lstm_kernel, seq_len=T, batch=Bp, num_rest=n_rest),
        out_shape=jax.ShapeDtypeStruct((Bp, O), jnp.float32),
        grid_spec=grid_spec,
        compiler_params=pltpu.CompilerParams(
            dimension_semantics=("arbitrary",),
            # Explicit budget: fits v5e's 16 MiB scoped default and v7x's
            # 64 MiB physical VMEM at realistic sequence lengths.
            vmem_limit_bytes=32 * 1024 * 1024),
    )(x_flat, wih0_t, whh0_t, b0, wihr, whhr, br, wfc_t, bfc)

    return out_pad[:B]


def init_params(key, input_dim, hidden_dim, layer_dim, output_dim):
    """Deterministic PyTorch-style uniform(-1/sqrt(H), 1/sqrt(H)) init."""
    D, H, L, O = input_dim, hidden_dim, layer_dim, output_dim
    k = 1.0 / float(jnp.sqrt(jnp.float32(H)))
    keys = jax.random.split(key, 4 * L + 2)
    params = {}
    idx = 0
    for l in range(L):
        in_dim = D if l == 0 else H
        params[f"w_ih_l{l}"] = jax.random.uniform(keys[idx], (4 * H, in_dim), jnp.float32, -k, k); idx += 1
        params[f"w_hh_l{l}"] = jax.random.uniform(keys[idx], (4 * H, H), jnp.float32, -k, k); idx += 1
        params[f"b_ih_l{l}"] = jax.random.uniform(keys[idx], (4 * H,), jnp.float32, -k, k); idx += 1
        params[f"b_hh_l{l}"] = jax.random.uniform(keys[idx], (4 * H,), jnp.float32, -k, k); idx += 1
    params["fc_w"] = jax.random.uniform(keys[idx], (O, H), jnp.float32, -k, k); idx += 1
    params["fc_b"] = jax.random.uniform(keys[idx], (O,), jnp.float32, -k, k)
    return params


def lstm_ref(x, params, hidden_dim, layer_dim, output_dim):
    """Pure-JAX f32 reference matching torch.nn.LSTM semantics (gate order i,f,g,o)."""
    B, T, D = x.shape
    H, L = hidden_dim, layer_dim
    h = [jnp.zeros((B, H), jnp.float32) for _ in range(L)]
    c = [jnp.zeros((B, H), jnp.float32) for _ in range(L)]
    last = None
    for t in range(T):
        inp = x[:, t, :]
        for l in range(L):
            b = params[f"b_ih_l{l}"] + params[f"b_hh_l{l}"]
            gates = inp @ params[f"w_ih_l{l}"].T + h[l] @ params[f"w_hh_l{l}"].T + b
            i_g, f_g, g_g, o_g = jnp.split(gates, 4, axis=1)
            i_g = jax.nn.sigmoid(i_g)
            f_g = jax.nn.sigmoid(f_g)
            g_g = jnp.tanh(g_g)
            o_g = jax.nn.sigmoid(o_g)
            c[l] = f_g * c[l] + i_g * g_g
            h[l] = o_g * jnp.tanh(c[l])
            inp = h[l]
        last = inp
    return last @ params["fc_w"].T + params["fc_b"]


if __name__ == "__main__":
    B, T = 2, 8                 # batch, sequence length
    D, H, L, O = 4, 32, 2, 4    # input_dim, hidden_dim, layer_dim, output_dim

    key = jax.random.PRNGKey(0)
    kx, kp = jax.random.split(key)
    x = jax.random.normal(kx, (B, T, D), jnp.float32)
    params = init_params(kp, D, H, L, O)

    out = lstm_model_forward(x, params, H, L, O)
    out = jax.block_until_ready(out)

    ref = lstm_ref(x, params, H, L, O)
    assert out.shape == (B, O)
    # bf16 MXU operands (review-approved) -> loosened tolerance vs f32 reference.
    assert jnp.allclose(out, ref, atol=1e-2, rtol=1e-2), (out, ref)
    print("KERNEL_OK")
</pallas_src>

<mosaic_0001>
module attributes {stable_mosaic.version = 11 : i64} {
  func.func @lstm_kernel(%arg0: i32, %arg1: memref<64x4xbf16, #tpu.memory_space<vmem>>, %arg2: memref<4x128xbf16, #tpu.memory_space<vmem>>, %arg3: memref<32x128xbf16, #tpu.memory_space<vmem>>, %arg4: memref<1x128xf32, #tpu.memory_space<vmem>>, %arg5: memref<1x32x128xbf16, #tpu.memory_space<vmem>>, %arg6: memref<1x32x128xbf16, #tpu.memory_space<vmem>>, %arg7: memref<1x1x128xf32, #tpu.memory_space<vmem>>, %arg8: memref<32x4xf32, #tpu.memory_space<vmem>>, %arg9: memref<1x4xf32, #tpu.memory_space<vmem>>, %arg10: memref<8x4xf32, #tpu.memory_space<vmem>>, %arg11: memref<64x128xf32, #tpu.memory_space<vmem>>) attributes {dimension_semantics = [#tpu.dimension_semantics<arbitrary>], iteration_bounds = array<i64: 1>, scalar_prefetch = 0 : i64, scratch_operands = 1 : i64, tpu.core_type = #tpu.core_type<tc>, window_params = [{pipeline_mode = #tpu.pipeline_mode<synchronous>, transform_indices = @transform_0, window_bounds = array<i64: 64, 4>}, {pipeline_mode = #tpu.pipeline_mode<synchronous>, transform_indices = @transform_1, window_bounds = array<i64: 4, 128>}, {pipeline_mode = #tpu.pipeline_mode<synchronous>, transform_indices = @transform_2, window_bounds = array<i64: 32, 128>}, {pipeline_mode = #tpu.pipeline_mode<synchronous>, transform_indices = @transform_3, window_bounds = array<i64: 1, 128>}, {pipeline_mode = #tpu.pipeline_mode<synchronous>, transform_indices = @transform_4, window_bounds = array<i64: 1, 32, 128>}, {pipeline_mode = #tpu.pipeline_mode<synchronous>, transform_indices = @transform_5, window_bounds = array<i64: 1, 32, 128>}, {pipeline_mode = #tpu.pipeline_mode<synchronous>, transform_indices = @transform_6, window_bounds = array<i64: 1, 1, 128>}, {pipeline_mode = #tpu.pipeline_mode<synchronous>, transform_indices = @transform_7, window_bounds = array<i64: 32, 4>}, {pipeline_mode = #tpu.pipeline_mode<synchronous>, transform_indices = @transform_8, window_bounds = array<i64: 1, 4>}, {pipeline_mode = #tpu.pipeline_mode<synchronous>, transform_indices = @transform_9, window_bounds = array<i64: 8, 4>}]} {
    %c0 = arith.constant 0 : index
    %c0_0 = arith.constant 0 : index
    %0 = vector.load %arg1[%c0, %c0_0] : memref<64x4xbf16, #tpu.memory_space<vmem>>, vector<64x4xbf16>
    %c0_1 = arith.constant 0 : index
    %c0_2 = arith.constant 0 : index
    %1 = vector.load %arg2[%c0_1, %c0_2] : memref<4x128xbf16, #tpu.memory_space<vmem>>, vector<4x128xbf16>
    %cst = arith.constant dense<0.000000e+00> : vector<64x128xf32>
    %2 = tpu.matmul %0, %1, %cst {dimension_numbers = #tpu.dot_dimension_numbers<[1], [0], [0], [1], [0, 0, 1, 1], [], []>} : vector<64x4xbf16>, vector<4x128xbf16>, vector<64x128xf32> -> vector<64x128xf32>
    %c0_3 = arith.constant 0 : index
    %c0_4 = arith.constant 0 : index
    %3 = vector.load %arg4[%c0_3, %c0_4] : memref<1x128xf32, #tpu.memory_space<vmem>>, vector<1x128xf32>
    %4 = vector.broadcast %3 : vector<1x128xf32> to vector<64x128xf32>
    %5 = arith.addf %2, %4 : vector<64x128xf32>
    %c0_5 = arith.constant 0 : index
    %c0_6 = arith.constant 0 : index
    %6 = vector.load %arg11[%c0_5, %c0_6] : memref<64x128xf32, #tpu.memory_space<vmem>>, vector<64x128xf32>
    tpu.vector_store %arg11[%c0_5, %c0_6], %5 {strides = array<i32>} : memref<64x128xf32, #tpu.memory_space<vmem>>, vector<64x128xf32>,
    %c0_7 = arith.constant 0 : index
    %c0_8 = arith.constant 0 : index
    %7 = vector.load %arg3[%c0_7, %c0_8] : memref<32x128xbf16, #tpu.memory_space<vmem>>, vector<32x128xbf16>
    %c0_9 = arith.constant 0 : index
    %c0_10 = arith.constant 0 : index
    %c0_11 = arith.constant 0 : index
    %8 = vector.load %arg5[%c0_9, %c0_10, %c0_11] : memref<1x32x128xbf16, #tpu.memory_space<vmem>>, vector<1x32x128xbf16>
    %9 = vector.shape_cast %8 : vector<1x32x128xbf16> to vector<32x128xbf16>
    %c0_12 = arith.constant 0 : index
    %c0_13 = arith.constant 0 : index
    %c0_14 = arith.constant 0 : index
    %10 = vector.load %arg6[%c0_12, %c0_13, %c0_14] : memref<1x32x128xbf16, #tpu.memory_space<vmem>>, vector<1x32x128xbf16>
    %11 = vector.shape_cast %10 : vector<1x32x128xbf16> to vector<32x128xbf16>
    %c0_15 = arith.constant 0 : index
    %c0_16 = arith.constant 0 : index
    %c0_17 = arith.constant 0 : index
    %12 = vector.load %arg7[%c0_15, %c0_16, %c0_17] : memref<1x1x128xf32, #tpu.memory_space<vmem>>, vector<1x1x128xf32>
    %13 = vector.shape_cast %12 : vector<1x1x128xf32> to vector<1x128xf32>
    %14 = tpu.iota {dimensions = array<i32: 1>} : vector<8x128xi32>
    %c64_i32 = arith.constant 64 : i32
    %15 = vector.broadcast %c64_i32 : i32 to vector<8x128xi32>
    %16 = arith.cmpi sge, %14, %15 : vector<8x128xi32>
    %c96_i32 = arith.constant 96 : i32
    %17 = vector.broadcast %c96_i32 : i32 to vector<8x128xi32>
    %18 = arith.cmpi slt, %14, %17 : vector<8x128xi32>
    %19 = arith.andi %16, %18 : vector<8x128xi1>
    %cst_18 = arith.constant 2.000000e+00 : f32
    %cst_19 = arith.constant 1.000000e+00 : f32
    %20 = vector.broadcast %cst_18 : f32 to vector<8x128xf32>
    %21 = vector.broadcast %cst_19 : f32 to vector<8x128xf32>
    %22 = arith.select %19, %20, %21 : vector<8x128xi1>, vector<8x128xf32>
    %cst_20 = arith.constant -1.000000e+00 : f32
    %cst_21 = arith.constant 0.000000e+00 : f32
    %23 = vector.broadcast %cst_20 : f32 to vector<8x128xf32>
    %24 = vector.broadcast %cst_21 : f32 to vector<8x128xf32>
    %25 = arith.select %19, %23, %24 : vector<8x128xi1>, vector<8x128xf32>
    %cst_22 = arith.constant 0.000000e+00 : f32
    %26 = vector.broadcast %cst_22 : f32 to vector<8x32xf32>
    %cst_23 = arith.constant 0.000000e+00 : f32
    %27 = vector.broadcast %cst_23 : f32 to vector<8x32xf32>
    %cst_24 = arith.constant 0.000000e+00 : f32
    %28 = vector.broadcast %cst_24 : f32 to vector<8x32xf32>
    %cst_25 = arith.constant 0.000000e+00 : f32
    %29 = vector.broadcast %cst_25 : f32 to vector<8x32xf32>
    %c0_i32 = arith.constant 0 : i32
    %c8_i32 = arith.constant 8 : i32
    %30 = arith.muli %c0_i32, %c8_i32 : i32
    %31 = tpu.assume_multiple %30, 8 : i32
    %32 = arith.truncf %26 : vector<8x32xf32> to vector<8x32xbf16>
    %cst_26 = arith.constant dense<0.000000e+00> : vector<8x128xf32>
    %33 = tpu.matmul %32, %7, %cst_26 {dimension_numbers = #tpu.dot_dimension_numbers<[1], [0], [0], [1], [0, 0, 1, 1], [], []>} : vector<8x32xbf16>, vector<32x128xbf16>, vector<8x128xf32> -> vector<8x128xf32>
    %34 = arith.truncf %27 : vector<8x32xf32> to vector<8x32xbf16>
    %cst_27 = arith.constant dense<0.000000e+00> : vector<8x128xf32>
    %35 = tpu.matmul %34, %11, %cst_27 {dimension_numbers = #tpu.dot_dimension_numbers<[1], [0], [0], [1], [0, 0, 1, 1], [], []>} : vector<8x32xbf16>, vector<32x128xbf16>, vector<8x128xf32> -> vector<8x128xf32>
    %36 = arith.index_cast %31 : i32 to index
    %c0_28 = arith.constant 0 : index
    %37 = vector.load %arg11[%36, %c0_28] : memref<64x128xf32, #tpu.memory_space<vmem>>, vector<8x128xf32>
    %38 = arith.addf %37, %33 : vector<8x128xf32>
    %39 = arith.negf %38 : vector<8x128xf32>
    %40 = math.exp %39 : vector<8x128xf32>
    %cst_29 = arith.constant 1.000000e+00 : f32
    %41 = vector.broadcast %cst_29 : f32 to vector<8x128xf32>
    %42 = arith.addf %41, %40 : vector<8x128xf32>
    %43 = arith.divf %41, %42 : vector<8x128xf32>
    %44 = arith.mulf %43, %22 : vector<8x128xf32>
    %45 = arith.addf %44, %25 : vector<8x128xf32>
    %46 = vector.extract_strided_slice %45 {offsets = [0, 0], sizes = [8, 32], strides = [1, 1]} : vector<8x128xf32> to vector<8x32xf32>
    %47 = vector.extract_strided_slice %45 {offsets = [0, 32], sizes = [8, 32], strides = [1, 1]} : vector<8x128xf32> to vector<8x32xf32>
    %48 = vector.extract_strided_slice %45 {offsets = [0, 64], sizes = [8, 32], strides = [1, 1]} : vector<8x128xf32> to vector<8x32xf32>
    %49 = vector.extract_strided_slice %45 {offsets = [0, 96], sizes = [8, 32], strides = [1, 1]} : vector<8x128xf32> to vector<8x32xf32>
    %50 = arith.mulf %47, %28 : vector<8x32xf32>
    %51 = arith.mulf %46, %48 : vector<8x32xf32>
    %52 = arith.addf %50, %51 : vector<8x32xf32>
    %53 = math.tanh %52 : vector<8x32xf32>
    %54 = arith.mulf %49, %53 : vector<8x32xf32>
    %55 = arith.truncf %54 : vector<8x32xf32> to vector<8x32xbf16>
    %cst_30 = arith.constant dense<0.000000e+00> : vector<8x128xf32>
    %56 = tpu.matmul %55, %9, %cst_30 {dimension_numbers = #tpu.dot_dimension_numbers<[1], [0], [0], [1], [0, 0, 1, 1], [], []>} : vector<8x32xbf16>, vector<32x128xbf16>, vector<8x128xf32> -> vector<8x128xf32>
    %57 = arith.addf %56, %35 : vector<8x128xf32>
    %58 = vector.broadcast %13 : vector<1x128xf32> to vector<8x128xf32>
    %59 = arith.addf %57, %58 : vector<8x128xf32>
    %60 = arith.negf %59 : vector<8x128xf32>
    %61 = math.exp %60 : vector<8x128xf32>
    %cst_31 = arith.constant 1.000000e+00 : f32
    %62 = vector.broadcast %cst_31 : f32 to vector<8x128xf32>
    %63 = arith.addf %62, %61 : vector<8x128xf32>
    %64 = arith.divf %62, %63 : vector<8x128xf32>
    %65 = arith.mulf %64, %22 : vector<8x128xf32>
    %66 = arith.addf %65, %25 : vector<8x128xf32>
    %67 = vector.extract_strided_slice %66 {offsets = [0, 0], sizes = [8, 32], strides = [1, 1]} : vector<8x128xf32> to vector<8x32xf32>
    %68 = vector.extract_strided_slice %66 {offsets = [0, 32], sizes = [8, 32], strides = [1, 1]} : vector<8x128xf32> to vector<8x32xf32>
    %69 = vector.extract_strided_slice %66 {offsets = [0, 64], sizes = [8, 32], strides = [1, 1]} : vector<8x128xf32> to vector<8x32xf32>
    %70 = vector.extract_strided_slice %66 {offsets = [0, 96], sizes = [8, 32], strides = [1, 1]} : vector<8x128xf32> to vector<8x32xf32>
    %71 = arith.mulf %68, %29 : vector<8x32xf32>
    %72 = arith.mulf %67, %69 : vector<8x32xf32>
    %73 = arith.addf %71, %72 : vector<8x32xf32>
    %74 = math.tanh %73 : vector<8x32xf32>
    %75 = arith.mulf %70, %74 : vector<8x32xf32>
    %c1_i32 = arith.constant 1 : i32
    %c8_i32_32 = arith.constant 8 : i32
    %76 = arith.muli %c1_i32, %c8_i32_32 : i32
    %77 = tpu.assume_multiple %76, 8 : i32
    %78 = arith.truncf %54 : vector<8x32xf32> to vector<8x32xbf16>
    %cst_33 = arith.constant dense<0.000000e+00> : vector<8x128xf32>
    %79 = tpu.matmul %78, %7, %cst_33 {dimension_numbers = #tpu.dot_dimension_numbers<[1], [0], [0], [1], [0, 0, 1, 1], [], []>} : vector<8x32xbf16>, vector<32x128xbf16>, vector<8x128xf32> -> vector<8x128xf32>
    %80 = arith.truncf %75 : vector<8x32xf32> to vector<8x32xbf16>
    %cst_34 = arith.constant dense<0.000000e+00> : vector<8x128xf32>
    %81 = tpu.matmul %80, %11, %cst_34 {dimension_numbers = #tpu.dot_dimension_numbers<[1], [0], [0], [1], [0, 0, 1, 1], [], []>} : vector<8x32xbf16>, vector<32x128xbf16>, vector<8x128xf32> -> vector<8x128xf32>
    %82 = arith.index_cast %77 : i32 to index
    %c0_35 = arith.constant 0 : index
    %83 = vector.load %arg11[%82, %c0_35] : memref<64x128xf32, #tpu.memory_space<vmem>>, vector<8x128xf32>
    %84 = arith.addf %83, %79 : vector<8x128xf32>
    %85 = arith.negf %84 : vector<8x128xf32>
    %86 = math.exp %85 : vector<8x128xf32>
    %cst_36 = arith.constant 1.000000e+00 : f32
    %87 = vector.broadcast %cst_36 : f32 to vector<8x128xf32>
    %88 = arith.addf %87, %86 : vector<8x128xf32>
    %89 = arith.divf %87, %88 : vector<8x128xf32>
    %90 = arith.mulf %89, %22 : vector<8x128xf32>
    %91 = arith.addf %90, %25 : vector<8x128xf32>
    %92 = vector.extract_strided_slice %91 {offsets = [0, 0], sizes = [8, 32], strides = [1, 1]} : vector<8x128xf32> to vector<8x32xf32>
    %93 = vector.extract_strided_slice %91 {offsets = [0, 32], sizes = [8, 32], strides = [1, 1]} : vector<8x128xf32> to vector<8x32xf32>
    %94 = vector.extract_strided_slice %91 {offsets = [0, 64], sizes = [8, 32], strides = [1, 1]} : vector<8x128xf32> to vector<8x32xf32>
    %95 = vector.extract_strided_slice %91 {offsets = [0, 96], sizes = [8, 32], strides = [1, 1]} : vector<8x128xf32> to vector<8x32xf32>
    %96 = arith.mulf %93, %52 : vector<8x32xf32>
    %97 = arith.mulf %92, %94 : vector<8x32xf32>
    %98 = arith.addf %96, %97 : vector<8x32xf32>
    %99 = math.tanh %98 : vector<8x32xf32>
    %100 = arith.mulf %95, %99 : vector<8x32xf32>
    %101 = arith.truncf %100 : vector<8x32xf32> to vector<8x32xbf16>
    %cst_37 = arith.constant dense<0.000000e+00> : vector<8x128xf32>
    %102 = tpu.matmul %101, %9, %cst_37 {dimension_numbers = #tpu.dot_dimension_numbers<[1], [0], [0], [1], [0, 0, 1, 1], [], []>} : vector<8x32xbf16>, vector<32x128xbf16>, vector<8x128xf32> -> vector<8x128xf32>
    %103 = arith.addf %102, %81 : vector<8x128xf32>
    %104 = vector.broadcast %13 : vector<1x128xf32> to vector<8x128xf32>
    %105 = arith.addf %103, %104 : vector<8x128xf32>
    %106 = arith.negf %105 : vector<8x128xf32>
    %107 = math.exp %106 : vector<8x128xf32>
    %cst_38 = arith.constant 1.000000e+00 : f32
    %108 = vector.broadcast %cst_38 : f32 to vector<8x128xf32>
    %109 = arith.addf %108, %107 : vector<8x128xf32>
    %110 = arith.divf %108, %109 : vector<8x128xf32>
    %111 = arith.mulf %110, %22 : vector<8x128xf32>
    %112 = arith.addf %111, %25 : vector<8x128xf32>
    %113 = vector.extract_strided_slice %112 {offsets = [0, 0], sizes = [8, 32], strides = [1, 1]} : vector<8x128xf32> to vector<8x32xf32>
    %114 = vector.extract_strided_slice %112 {offsets = [0, 32], sizes = [8, 32], strides = [1, 1]} : vector<8x128xf32> to vector<8x32xf32>
    %115 = vector.extract_strided_slice %112 {offsets = [0, 64], sizes = [8, 32], strides = [1, 1]} : vector<8x128xf32> to vector<8x32xf32>
    %116 = vector.extract_strided_slice %112 {offsets = [0, 96], sizes = [8, 32], strides = [1, 1]} : vector<8x128xf32> to vector<8x32xf32>
    %117 = arith.mulf %114, %73 : vector<8x32xf32>
    %118 = arith.mulf %113, %115 : vector<8x32xf32>
    %119 = arith.addf %117, %118 : vector<8x32xf32>
    %120 = math.tanh %119 : vector<8x32xf32>
    %121 = arith.mulf %116, %120 : vector<8x32xf32>
    %c2_i32 = arith.constant 2 : i32
    %c8_i32_39 = arith.constant 8 : i32
    %122 = arith.muli %c2_i32, %c8_i32_39 : i32
    %123 = tpu.assume_multiple %122, 8 : i32
    %124 = arith.truncf %100 : vector<8x32xf32> to vector<8x32xbf16>
    %cst_40 = arith.constant dense<0.000000e+00> : vector<8x128xf32>
    %125 = tpu.matmul %124, %7, %cst_40 {dimension_numbers = #tpu.dot_dimension_numbers<[1], [0], [0], [1], [0, 0, 1, 1], [], []>} : vector<8x32xbf16>, vector<32x128xbf16>, vector<8x128xf32> -> vector<8x128xf32>
    %126 = arith.truncf %121 : vector<8x32xf32> to vector<8x32xbf16>
    %cst_41 = arith.constant dense<0.000000e+00> : vector<8x128xf32>
    %127 = tpu.matmul %126, %11, %cst_41 {dimension_numbers = #tpu.dot_dimension_numbers<[1], [0], [0], [1], [0, 0, 1, 1], [], []>} : vector<8x32xbf16>, vector<32x128xbf16>, vector<8x128xf32> -> vector<8x128xf32>
    %128 = arith.index_cast %123 : i32 to index
    %c0_42 = arith.constant 0 : index
    %129 = vector.load %arg11[%128, %c0_42] : memref<64x128xf32, #tpu.memory_space<vmem>>, vector<8x128xf32>
    %130 = arith.addf %129, %125 : vector<8x128xf32>
    %131 = arith.negf %130 : vector<8x128xf32>
    %132 = math.exp %131 : vector<8x128xf32>
    %cst_43 = arith.constant 1.000000e+00 : f32
    %133 = vector.broadcast %cst_43 : f32 to vector<8x128xf32>
    %134 = arith.addf %133, %132 : vector<8x128xf32>
    %135 = arith.divf %133, %134 : vector<8x128xf32>
    %136 = arith.mulf %135, %22 : vector<8x128xf32>
    %137 = arith.addf %136, %25 : vector<8x128xf32>
    %138 = vector.extract_strided_slice %137 {offsets = [0, 0], sizes = [8, 32], strides = [1, 1]} : vector<8x128xf32> to vector<8x32xf32>
    %139 = vector.extract_strided_slice %137 {offsets = [0, 32], sizes = [8, 32], strides = [1, 1]} : vector<8x128xf32> to vector<8x32xf32>
    %140 = vector.extract_strided_slice %137 {offsets = [0, 64], sizes = [8, 32], strides = [1, 1]} : vector<8x128xf32> to vector<8x32xf32>
    %141 = vector.extract_strided_slice %137 {offsets = [0, 96], sizes = [8, 32], strides = [1, 1]} : vector<8x128xf32> to vector<8x32xf32>
    %142 = arith.mulf %139, %98 : vector<8x32xf32>
    %143 = arith.mulf %138, %140 : vector<8x32xf32>
    %144 = arith.addf %142, %143 : vector<8x32xf32>
    %145 = math.tanh %144 : vector<8x32xf32>
    %146 = arith.mulf %141, %145 : vector<8x32xf32>
    %147 = arith.truncf %146 : vector<8x32xf32> to vector<8x32xbf16>
    %cst_44 = arith.constant dense<0.000000e+00> : vector<8x128xf32>
    %148 = tpu.matmul %147, %9, %cst_44 {dimension_numbers = #tpu.dot_dimension_numbers<[1], [0], [0], [1], [0, 0, 1, 1], [], []>} : vector<8x32xbf16>, vector<32x128xbf16>, vector<8x128xf32> -> vector<8x128xf32>
    %149 = arith.addf %148, %127 : vector<8x128xf32>
    %150 = vector.broadcast %13 : vector<1x128xf32> to vector<8x128xf32>
    %151 = arith.addf %149, %150 : vector<8x128xf32>
    %152 = arith.negf %151 : vector<8x128xf32>
    %153 = math.exp %152 : vector<8x128xf32>
    %cst_45 = arith.constant 1.000000e+00 : f32
    %154 = vector.broadcast %cst_45 : f32 to vector<8x128xf32>
    %155 = arith.addf %154, %153 : vector<8x128xf32>
    %156 = arith.divf %154, %155 : vector<8x128xf32>
    %157 = arith.mulf %156, %22 : vector<8x128xf32>
    %158 = arith.addf %157, %25 : vector<8x128xf32>
    %159 = vector.extract_strided_slice %158 {offsets = [0, 0], sizes = [8, 32], strides = [1, 1]} : vector<8x128xf32> to vector<8x32xf32>
    %160 = vector.extract_strided_slice %158 {offsets = [0, 32], sizes = [8, 32], strides = [1, 1]} : vector<8x128xf32> to vector<8x32xf32>
    %161 = vector.extract_strided_slice %158 {offsets = [0, 64], sizes = [8, 32], strides = [1, 1]} : vector<8x128xf32> to vector<8x32xf32>
    %162 = vector.extract_strided_slice %158 {offsets = [0, 96], sizes = [8, 32], strides = [1, 1]} : vector<8x128xf32> to vector<8x32xf32>
    %163 = arith.mulf %160, %119 : vector<8x32xf32>
    %164 = arith.mulf %159, %161 : vector<8x32xf32>
    %165 = arith.addf %163, %164 : vector<8x32xf32>
    %166 = math.tanh %165 : vector<8x32xf32>
    %167 = arith.mulf %162, %166 : vector<8x32xf32>
    %c3_i32 = arith.constant 3 : i32
    %c8_i32_46 = arith.constant 8 : i32
    %168 = arith.muli %c3_i32, %c8_i32_46 : i32
    %169 = tpu.assume_multiple %168, 8 : i32
    %170 = arith.truncf %146 : vector<8x32xf32> to vector<8x32xbf16>
    %cst_47 = arith.constant dense<0.000000e+00> : vector<8x128xf32>
    %171 = tpu.matmul %170, %7, %cst_47 {dimension_numbers = #tpu.dot_dimension_numbers<[1], [0], [0], [1], [0, 0, 1, 1], [], []>} : vector<8x32xbf16>, vector<32x128xbf16>, vector<8x128xf32> -> vector<8x128xf32>
    %172 = arith.truncf %167 : vector<8x32xf32> to vector<8x32xbf16>
    %cst_48 = arith.constant dense<0.000000e+00> : vector<8x128xf32>
    %173 = tpu.matmul %172, %11, %cst_48 {dimension_numbers = #tpu.dot_dimension_numbers<[1], [0], [0], [1], [0, 0, 1, 1], [], []>} : vector<8x32xbf16>, vector<32x128xbf16>, vector<8x128xf32> -> vector<8x128xf32>
    %174 = arith.index_cast %169 : i32 to index
    %c0_49 = arith.constant 0 : index
    %175 = vector.load %arg11[%174, %c0_49] : memref<64x128xf32, #tpu.memory_space<vmem>>, vector<8x128xf32>
    %176 = arith.addf %175, %171 : vector<8x128xf32>
    %177 = arith.negf %176 : vector<8x128xf32>
    %178 = math.exp %177 : vector<8x128xf32>
    %cst_50 = arith.constant 1.000000e+00 : f32
    %179 = vector.broadcast %cst_50 : f32 to vector<8x128xf32>
    %180 = arith.addf %179, %178 : vector<8x128xf32>
    %181 = arith.divf %179, %180 : vector<8x128xf32>
    %182 = arith.mulf %181, %22 : vector<8x128xf32>
    %183 = arith.addf %182, %25 : vector<8x128xf32>
    %184 = vector.extract_strided_slice %183 {offsets = [0, 0], sizes = [8, 32], strides = [1, 1]} : vector<8x128xf32> to vector<8x32xf32>
    %185 = vector.extract_strided_slice %183 {offsets = [0, 32], sizes = [8, 32], strides = [1, 1]} : vector<8x128xf32> to vector<8x32xf32>
    %186 = vector.extract_strided_slice %183 {offsets = [0, 64], sizes = [8, 32], strides = [1, 1]} : vector<8x128xf32> to vector<8x32xf32>
    %187 = vector.extract_strided_slice %183 {offsets = [0, 96], sizes = [8, 32], strides = [1, 1]} : vector<8x128xf32> to vector<8x32xf32>
    %188 = arith.mulf %185, %144 : vector<8x32xf32>
    %189 = arith.mulf %184, %186 : vector<8x32xf32>
    %190 = arith.addf %188, %189 : vector<8x32xf32>
    %191 = math.tanh %190 : vector<8x32xf32>
    %192 = arith.mulf %187, %191 : vector<8x32xf32>
    %193 = arith.truncf %192 : vector<8x32xf32> to vector<8x32xbf16>
    %cst_51 = arith.constant dense<0.000000e+00> : vector<8x128xf32>
    %194 = tpu.matmul %193, %9, %cst_51 {dimension_numbers = #tpu.dot_dimension_numbers<[1], [0], [0], [1], [0, 0, 1, 1], [], []>} : vector<8x32xbf16>, vector<32x128xbf16>, vector<8x128xf32> -> vector<8x128xf32>
    %195 = arith.addf %194, %173 : vector<8x128xf32>
    %196 = vector.broadcast %13 : vector<1x128xf32> to vector<8x128xf32>
    %197 = arith.addf %195, %196 : vector<8x128xf32>
    %198 = arith.negf %197 : vector<8x128xf32>
    %199 = math.exp %198 : vector<8x128xf32>
    %cst_52 = arith.constant 1.000000e+00 : f32
    %200 = vector.broadcast %cst_52 : f32 to vector<8x128xf32>
    %201 = arith.addf %200, %199 : vector<8x128xf32>
    %202 = arith.divf %200, %201 : vector<8x128xf32>
    %203 = arith.mulf %202, %22 : vector<8x128xf32>
    %204 = arith.addf %203, %25 : vector<8x128xf32>
    %205 = vector.extract_strided_slice %204 {offsets = [0, 0], sizes = [8, 32], strides = [1, 1]} : vector<8x128xf32> to vector<8x32xf32>
    %206 = vector.extract_strided_slice %204 {offsets = [0, 32], sizes = [8, 32], strides = [1, 1]} : vector<8x128xf32> to vector<8x32xf32>
    %207 = vector.extract_strided_slice %204 {offsets = [0, 64], sizes = [8, 32], strides = [1, 1]} : vector<8x128xf32> to vector<8x32xf32>
    %208 = vector.extract_strided_slice %204 {offsets = [0, 96], sizes = [8, 32], strides = [1, 1]} : vector<8x128xf32> to vector<8x32xf32>
    %209 = arith.mulf %206, %165 : vector<8x32xf32>
    %210 = arith.mulf %205, %207 : vector<8x32xf32>
    %211 = arith.addf %209, %210 : vector<8x32xf32>
    %212 = math.tanh %211 : vector<8x32xf32>
    %213 = arith.mulf %208, %212 : vector<8x32xf32>
    %c4_i32 = arith.constant 4 : i32
    %c8_i32_53 = arith.constant 8 : i32
    %214 = arith.muli %c4_i32, %c8_i32_53 : i32
    %215 = tpu.assume_multiple %214, 8 : i32
    %216 = arith.truncf %192 : vector<8x32xf32> to vector<8x32xbf16>
    %cst_54 = arith.constant dense<0.000000e+00> : vector<8x128xf32>
    %217 = tpu.matmul %216, %7, %cst_54 {dimension_numbers = #tpu.dot_dimension_numbers<[1], [0], [0], [1], [0, 0, 1, 1], [], []>} : vector<8x32xbf16>, vector<32x128xbf16>, vector<8x128xf32> -> vector<8x128xf32>
    %218 = arith.truncf %213 : vector<8x32xf32> to vector<8x32xbf16>
    %cst_55 = arith.constant dense<0.000000e+00> : vector<8x128xf32>
    %219 = tpu.matmul %218, %11, %cst_55 {dimension_numbers = #tpu.dot_dimension_numbers<[1], [0], [0], [1], [0, 0, 1, 1], [], []>} : vector<8x32xbf16>, vector<32x128xbf16>, vector<8x128xf32> -> vector<8x128xf32>
    %220 = arith.index_cast %215 : i32 to index
    %c0_56 = arith.constant 0 : index
    %221 = vector.load %arg11[%220, %c0_56] : memref<64x128xf32, #tpu.memory_space<vmem>>, vector<8x128xf32>
    %222 = arith.addf %221, %217 : vector<8x128xf32>
    %223 = arith.negf %222 : vector<8x128xf32>
    %224 = math.exp %223 : vector<8x128xf32>
    %cst_57 = arith.constant 1.000000e+00 : f32
    %225 = vector.broadcast %cst_57 : f32 to vector<8x128xf32>
    %226 = arith.addf %225, %224 : vector<8x128xf32>
    %227 = arith.divf %225, %226 : vector<8x128xf32>
    %228 = arith.mulf %227, %22 : vector<8x128xf32>
    %229 = arith.addf %228, %25 : vector<8x128xf32>
    %230 = vector.extract_strided_slice %229 {offsets = [0, 0], sizes = [8, 32], strides = [1, 1]} : vector<8x128xf32> to vector<8x32xf32>
    %231 = vector.extract_strided_slice %229 {offsets = [0, 32], sizes = [8, 32], strides = [1, 1]} : vector<8x128xf32> to vector<8x32xf32>
    %232 = vector.extract_strided_slice %229 {offsets = [0, 64], sizes = [8, 32], strides = [1, 1]} : vector<8x128xf32> to vector<8x32xf32>
    %233 = vector.extract_strided_slice %229 {offsets = [0, 96], sizes = [8, 32], strides = [1, 1]} : vector<8x128xf32> to vector<8x32xf32>
    %234 = arith.mulf %231, %190 : vector<8x32xf32>
    %235 = arith.mulf %230, %232 : vector<8x32xf32>
    %236 = arith.addf %234, %235 : vector<8x32xf32>
    %237 = math.tanh %236 : vector<8x32xf32>
    %238 = arith.mulf %233, %237 : vector<8x32xf32>
    %239 = arith.truncf %238 : vector<8x32xf32> to vector<8x32xbf16>
    %cst_58 = arith.constant dense<0.000000e+00> : vector<8x128xf32>
    %240 = tpu.matmul %239, %9, %cst_58 {dimension_numbers = #tpu.dot_dimension_numbers<[1], [0], [0], [1], [0, 0, 1, 1], [], []>} : vector<8x32xbf16>, vector<32x128xbf16>, vector<8x128xf32> -> vector<8x128xf32>
    %241 = arith.addf %240, %219 : vector<8x128xf32>
    %242 = vector.broadcast %13 : vector<1x128xf32> to vector<8x128xf32>
    %243 = arith.addf %241, %242 : vector<8x128xf32>
    %244 = arith.negf %243 : vector<8x128xf32>
    %245 = math.exp %244 : vector<8x128xf32>
    %cst_59 = arith.constant 1.000000e+00 : f32
    %246 = vector.broadcast %cst_59 : f32 to vector<8x128xf32>
    %247 = arith.addf %246, %245 : vector<8x128xf32>
    %248 = arith.divf %246, %247 : vector<8x128xf32>
    %249 = arith.mulf %248, %22 : vector<8x128xf32>
    %250 = arith.addf %249, %25 : vector<8x128xf32>
    %251 = vector.extract_strided_slice %250 {offsets = [0, 0], sizes = [8, 32], strides = [1, 1]} : vector<8x128xf32> to vector<8x32xf32>
    %252 = vector.extract_strided_slice %250 {offsets = [0, 32], sizes = [8, 32], strides = [1, 1]} : vector<8x128xf32> to vector<8x32xf32>
    %253 = vector.extract_strided_slice %250 {offsets = [0, 64], sizes = [8, 32], strides = [1, 1]} : vector<8x128xf32> to vector<8x32xf32>
    %254 = vector.extract_strided_slice %250 {offsets = [0, 96], sizes = [8, 32], strides = [1, 1]} : vector<8x128xf32> to vector<8x32xf32>
    %255 = arith.mulf %252, %211 : vector<8x32xf32>
    %256 = arith.mulf %251, %253 : vector<8x32xf32>
    %257 = arith.addf %255, %256 : vector<8x32xf32>
    %258 = math.tanh %257 : vector<8x32xf32>
    %259 = arith.mulf %254, %258 : vector<8x32xf32>
    %c5_i32 = arith.constant 5 : i32
    %c8_i32_60 = arith.constant 8 : i32
    %260 = arith.muli %c5_i32, %c8_i32_60 : i32
    %261 = tpu.assume_multiple %260, 8 : i32
    %262 = arith.truncf %238 : vector<8x32xf32> to vector<8x32xbf16>
    %cst_61 = arith.constant dense<0.000000e+00> : vector<8x128xf32>
    %263 = tpu.matmul %262, %7, %cst_61 {dimension_numbers = #tpu.dot_dimension_numbers<[1], [0], [0], [1], [0, 0, 1, 1], [], []>} : vector<8x32xbf16>, vector<32x128xbf16>, vector<8x128xf32> -> vector<8x128xf32>
    %264 = arith.truncf %259 : vector<8x32xf32> to vector<8x32xbf16>
    %cst_62 = arith.constant dense<0.000000e+00> : vector<8x128xf32>
    %265 = tpu.matmul %264, %11, %cst_62 {dimension_numbers = #tpu.dot_dimension_numbers<[1], [0], [0], [1], [0, 0, 1, 1], [], []>} : vector<8x32xbf16>, vector<32x128xbf16>, vector<8x128xf32> -> vector<8x128xf32>
    %266 = arith.index_cast %261 : i32 to index
    %c0_63 = arith.constant 0 : index
    %267 = vector.load %arg11[%266, %c0_63] : memref<64x128xf32, #tpu.memory_space<vmem>>, vector<8x128xf32>
    %268 = arith.addf %267, %263 : vector<8x128xf32>
    %269 = arith.negf %268 : vector<8x128xf32>
    %270 = math.exp %269 : vector<8x128xf32>
    %cst_64 = arith.constant 1.000000e+00 : f32
    %271 = vector.broadcast %cst_64 : f32 to vector<8x128xf32>
    %272 = arith.addf %271, %270 : vector<8x128xf32>
    %273 = arith.divf %271, %272 : vector<8x128xf32>
    %274 = arith.mulf %273, %22 : vector<8x128xf32>
    %275 = arith.addf %274, %25 : vector<8x128xf32>
    %276 = vector.extract_strided_slice %275 {offsets = [0, 0], sizes = [8, 32], strides = [1, 1]} : vector<8x128xf32> to vector<8x32xf32>
    %277 = vector.extract_strided_slice %275 {offsets = [0, 32], sizes = [8, 32], strides = [1, 1]} : vector<8x128xf32> to vector<8x32xf32>
    %278 = vector.extract_strided_slice %275 {offsets = [0, 64], sizes = [8, 32], strides = [1, 1]} : vector<8x128xf32> to vector<8x32xf32>
    %279 = vector.extract_strided_slice %275 {offsets = [0, 96], sizes = [8, 32], strides = [1, 1]} : vector<8x128xf32> to vector<8x32xf32>
    %280 = arith.mulf %277, %236 : vector<8x32xf32>
    %281 = arith.mulf %276, %278 : vector<8x32xf32>
    %282 = arith.addf %280, %281 : vector<8x32xf32>
    %283 = math.tanh %282 : vector<8x32xf32>
    %284 = arith.mulf %279, %283 : vector<8x32xf32>
    %285 = arith.truncf %284 : vector<8x32xf32> to vector<8x32xbf16>
    %cst_65 = arith.constant dense<0.000000e+00> : vector<8x128xf32>
    %286 = tpu.matmul %285, %9, %cst_65 {dimension_numbers = #tpu.dot_dimension_numbers<[1], [0], [0], [1], [0, 0, 1, 1], [], []>} : vector<8x32xbf16>, vector<32x128xbf16>, vector<8x128xf32> -> vector<8x128xf32>
    %287 = arith.addf %286, %265 : vector<8x128xf32>
    %288 = vector.broadcast %13 : vector<1x128xf32> to vector<8x128xf32>
    %289 = arith.addf %287, %288 : vector<8x128xf32>
    %290 = arith.negf %289 : vector<8x128xf32>
    %291 = math.exp %290 : vector<8x128xf32>
    %cst_66 = arith.constant 1.000000e+00 : f32
    %292 = vector.broadcast %cst_66 : f32 to vector<8x128xf32>
    %293 = arith.addf %292, %291 : vector<8x128xf32>
    %294 = arith.divf %292, %293 : vector<8x128xf32>
    %295 = arith.mulf %294, %22 : vector<8x128xf32>
    %296 = arith.addf %295, %25 : vector<8x128xf32>
    %297 = vector.extract_strided_slice %296 {offsets = [0, 0], sizes = [8, 32], strides = [1, 1]} : vector<8x128xf32> to vector<8x32xf32>
    %298 = vector.extract_strided_slice %296 {offsets = [0, 32], sizes = [8, 32], strides = [1, 1]} : vector<8x128xf32> to vector<8x32xf32>
    %299 = vector.extract_strided_slice %296 {offsets = [0, 64], sizes = [8, 32], strides = [1, 1]} : vector<8x128xf32> to vector<8x32xf32>
    %300 = vector.extract_strided_slice %296 {offsets = [0, 96], sizes = [8, 32], strides = [1, 1]} : vector<8x128xf32> to vector<8x32xf32>
    %301 = arith.mulf %298, %257 : vector<8x32xf32>
    %302 = arith.mulf %297, %299 : vector<8x32xf32>
    %303 = arith.addf %301, %302 : vector<8x32xf32>
    %304 = math.tanh %303 : vector<8x32xf32>
    %305 = arith.mulf %300, %304 : vector<8x32xf32>
    %c6_i32 = arith.constant 6 : i32
    %c8_i32_67 = arith.constant 8 : i32
    %306 = arith.muli %c6_i32, %c8_i32_67 : i32
    %307 = tpu.assume_multiple %306, 8 : i32
    %308 = arith.truncf %284 : vector<8x32xf32> to vector<8x32xbf16>
    %cst_68 = arith.constant dense<0.000000e+00> : vector<8x128xf32>
    %309 = tpu.matmul %308, %7, %cst_68 {dimension_numbers = #tpu.dot_dimension_numbers<[1], [0], [0], [1], [0, 0, 1, 1], [], []>} : vector<8x32xbf16>, vector<32x128xbf16>, vector<8x128xf32> -> vector<8x128xf32>
    %310 = arith.truncf %305 : vector<8x32xf32> to vector<8x32xbf16>
    %cst_69 = arith.constant dense<0.000000e+00> : vector<8x128xf32>
    %311 = tpu.matmul %310, %11, %cst_69 {dimension_numbers = #tpu.dot_dimension_numbers<[1], [0], [0], [1], [0, 0, 1, 1], [], []>} : vector<8x32xbf16>, vector<32x128xbf16>, vector<8x128xf32> -> vector<8x128xf32>
    %312 = arith.index_cast %307 : i32 to index
    %c0_70 = arith.constant 0 : index
    %313 = vector.load %arg11[%312, %c0_70] : memref<64x128xf32, #tpu.memory_space<vmem>>, vector<8x128xf32>
    %314 = arith.addf %313, %309 : vector<8x128xf32>
    %315 = arith.negf %314 : vector<8x128xf32>
    %316 = math.exp %315 : vector<8x128xf32>
    %cst_71 = arith.constant 1.000000e+00 : f32
    %317 = vector.broadcast %cst_71 : f32 to vector<8x128xf32>
    %318 = arith.addf %317, %316 : vector<8x128xf32>
    %319 = arith.divf %317, %318 : vector<8x128xf32>
    %320 = arith.mulf %319, %22 : vector<8x128xf32>
    %321 = arith.addf %320, %25 : vector<8x128xf32>
    %322 = vector.extract_strided_slice %321 {offsets = [0, 0], sizes = [8, 32], strides = [1, 1]} : vector<8x128xf32> to vector<8x32xf32>
    %323 = vector.extract_strided_slice %321 {offsets = [0, 32], sizes = [8, 32], strides = [1, 1]} : vector<8x128xf32> to vector<8x32xf32>
    %324 = vector.extract_strided_slice %321 {offsets = [0, 64], sizes = [8, 32], strides = [1, 1]} : vector<8x128xf32> to vector<8x32xf32>
    %325 = vector.extract_strided_slice %321 {offsets = [0, 96], sizes = [8, 32], strides = [1, 1]} : vector<8x128xf32> to vector<8x32xf32>
    %326 = arith.mulf %323, %282 : vector<8x32xf32>
    %327 = arith.mulf %322, %324 : vector<8x32xf32>
    %328 = arith.addf %326, %327 : vector<8x32xf32>
    %329 = math.tanh %328 : vector<8x32xf32>
    %330 = arith.mulf %325, %329 : vector<8x32xf32>
    %331 = arith.truncf %330 : vector<8x32xf32> to vector<8x32xbf16>
    %cst_72 = arith.constant dense<0.000000e+00> : vector<8x128xf32>
    %332 = tpu.matmul %331, %9, %cst_72 {dimension_numbers = #tpu.dot_dimension_numbers<[1], [0], [0], [1], [0, 0, 1, 1], [], []>} : vector<8x32xbf16>, vector<32x128xbf16>, vector<8x128xf32> -> vector<8x128xf32>
    %333 = arith.addf %332, %311 : vector<8x128xf32>
    %334 = vector.broadcast %13 : vector<1x128xf32> to vector<8x128xf32>
    %335 = arith.addf %333, %334 : vector<8x128xf32>
    %336 = arith.negf %335 : vector<8x128xf32>
    %337 = math.exp %336 : vector<8x128xf32>
    %cst_73 = arith.constant 1.000000e+00 : f32
    %338 = vector.broadcast %cst_73 : f32 to vector<8x128xf32>
    %339 = arith.addf %338, %337 : vector<8x128xf32>
    %340 = arith.divf %338, %339 : vector<8x128xf32>
    %341 = arith.mulf %340, %22 : vector<8x128xf32>
    %342 = arith.addf %341, %25 : vector<8x128xf32>
    %343 = vector.extract_strided_slice %342 {offsets = [0, 0], sizes = [8, 32], strides = [1, 1]} : vector<8x128xf32> to vector<8x32xf32>
    %344 = vector.extract_strided_slice %342 {offsets = [0, 32], sizes = [8, 32], strides = [1, 1]} : vector<8x128xf32> to vector<8x32xf32>
    %345 = vector.extract_strided_slice %342 {offsets = [0, 64], sizes = [8, 32], strides = [1, 1]} : vector<8x128xf32> to vector<8x32xf32>
    %346 = vector.extract_strided_slice %342 {offsets = [0, 96], sizes = [8, 32], strides = [1, 1]} : vector<8x128xf32> to vector<8x32xf32>
    %347 = arith.mulf %344, %303 : vector<8x32xf32>
    %348 = arith.mulf %343, %345 : vector<8x32xf32>
    %349 = arith.addf %347, %348 : vector<8x32xf32>
    %350 = math.tanh %349 : vector<8x32xf32>
    %351 = arith.mulf %346, %350 : vector<8x32xf32>
    %c7_i32 = arith.constant 7 : i32
    %c8_i32_74 = arith.constant 8 : i32
    %352 = arith.muli %c7_i32, %c8_i32_74 : i32
    %353 = tpu.assume_multiple %352, 8 : i32
    %354 = arith.truncf %330 : vector<8x32xf32> to vector<8x32xbf16>
    %cst_75 = arith.constant dense<0.000000e+00> : vector<8x128xf32>
    %355 = tpu.matmul %354, %7, %cst_75 {dimension_numbers = #tpu.dot_dimension_numbers<[1], [0], [0], [1], [0, 0, 1, 1], [], []>} : vector<8x32xbf16>, vector<32x128xbf16>, vector<8x128xf32> -> vector<8x128xf32>
    %356 = arith.truncf %351 : vector<8x32xf32> to vector<8x32xbf16>
    %cst_76 = arith.constant dense<0.000000e+00> : vector<8x128xf32>
    %357 = tpu.matmul %356, %11, %cst_76 {dimension_numbers = #tpu.dot_dimension_numbers<[1], [0], [0], [1], [0, 0, 1, 1], [], []>} : vector<8x32xbf16>, vector<32x128xbf16>, vector<8x128xf32> -> vector<8x128xf32>
    %358 = arith.index_cast %353 : i32 to index
    %c0_77 = arith.constant 0 : index
    %359 = vector.load %arg11[%358, %c0_77] : memref<64x128xf32, #tpu.memory_space<vmem>>, vector<8x128xf32>
    %360 = arith.addf %359, %355 : vector<8x128xf32>
    %361 = arith.negf %360 : vector<8x128xf32>
    %362 = math.exp %361 : vector<8x128xf32>
    %cst_78 = arith.constant 1.000000e+00 : f32
    %363 = vector.broadcast %cst_78 : f32 to vector<8x128xf32>
    %364 = arith.addf %363, %362 : vector<8x128xf32>
    %365 = arith.divf %363, %364 : vector<8x128xf32>
    %366 = arith.mulf %365, %22 : vector<8x128xf32>
    %367 = arith.addf %366, %25 : vector<8x128xf32>
    %368 = vector.extract_strided_slice %367 {offsets = [0, 0], sizes = [8, 32], strides = [1, 1]} : vector<8x128xf32> to vector<8x32xf32>
    %369 = vector.extract_strided_slice %367 {offsets = [0, 32], sizes = [8, 32], strides = [1, 1]} : vector<8x128xf32> to vector<8x32xf32>
    %370 = vector.extract_strided_slice %367 {offsets = [0, 64], sizes = [8, 32], strides = [1, 1]} : vector<8x128xf32> to vector<8x32xf32>
    %371 = vector.extract_strided_slice %367 {offsets = [0, 96], sizes = [8, 32], strides = [1, 1]} : vector<8x128xf32> to vector<8x32xf32>
    %372 = arith.mulf %369, %328 : vector<8x32xf32>
    %373 = arith.mulf %368, %370 : vector<8x32xf32>
    %374 = arith.addf %372, %373 : vector<8x32xf32>
    %375 = math.tanh %374 : vector<8x32xf32>
    %376 = arith.mulf %371, %375 : vector<8x32xf32>
    %377 = arith.truncf %376 : vector<8x32xf32> to vector<8x32xbf16>
    %cst_79 = arith.constant dense<0.000000e+00> : vector<8x128xf32>
    %378 = tpu.matmul %377, %9, %cst_79 {dimension_numbers = #tpu.dot_dimension_numbers<[1], [0], [0], [1], [0, 0, 1, 1], [], []>} : vector<8x32xbf16>, vector<32x128xbf16>, vector<8x128xf32> -> vector<8x128xf32>
    %379 = arith.addf %378, %357 : vector<8x128xf32>
    %380 = vector.broadcast %13 : vector<1x128xf32> to vector<8x128xf32>
    %381 = arith.addf %379, %380 : vector<8x128xf32>
    %382 = arith.negf %381 : vector<8x128xf32>
    %383 = math.exp %382 : vector<8x128xf32>
    %cst_80 = arith.constant 1.000000e+00 : f32
    %384 = vector.broadcast %cst_80 : f32 to vector<8x128xf32>
    %385 = arith.addf %384, %383 : vector<8x128xf32>
    %386 = arith.divf %384, %385 : vector<8x128xf32>
    %387 = arith.mulf %386, %22 : vector<8x128xf32>
    %388 = arith.addf %387, %25 : vector<8x128xf32>
    %389 = vector.extract_strided_slice %388 {offsets = [0, 0], sizes = [8, 32], strides = [1, 1]} : vector<8x128xf32> to vector<8x32xf32>
    %390 = vector.extract_strided_slice %388 {offsets = [0, 32], sizes = [8, 32], strides = [1, 1]} : vector<8x128xf32> to vector<8x32xf32>
    %391 = vector.extract_strided_slice %388 {offsets = [0, 64], sizes = [8, 32], strides = [1, 1]} : vector<8x128xf32> to vector<8x32xf32>
    %392 = vector.extract_strided_slice %388 {offsets = [0, 96], sizes = [8, 32], strides = [1, 1]} : vector<8x128xf32> to vector<8x32xf32>
    %393 = arith.mulf %390, %349 : vector<8x32xf32>
    %394 = arith.mulf %389, %391 : vector<8x32xf32>
    %395 = arith.addf %393, %394 : vector<8x32xf32>
    %396 = math.tanh %395 : vector<8x32xf32>
    %397 = arith.mulf %392, %396 : vector<8x32xf32>
    %c8_i32_81 = arith.constant 8 : i32
    %c0_82 = arith.constant 0 : index
    %c0_83 = arith.constant 0 : index
    %398 = vector.load %arg8[%c0_82, %c0_83] : memref<32x4xf32, #tpu.memory_space<vmem>>, vector<32x4xf32>
    %cst_84 = arith.constant dense<0.000000e+00> : vector<8x4xf32>
    %399 = tpu.matmul %397, %398, %cst_84 {dimension_numbers = #tpu.dot_dimension_numbers<[1], [0], [0], [1], [0, 0, 1, 1], [], []>} : vector<8x32xf32>, vector<32x4xf32>, vector<8x4xf32> -> vector<8x4xf32>
    %c0_85 = arith.constant 0 : index
    %c0_86 = arith.constant 0 : index
    %400 = vector.load %arg9[%c0_85, %c0_86] : memref<1x4xf32, #tpu.memory_space<vmem>>, vector<1x4xf32>
    %401 = vector.broadcast %400 : vector<1x4xf32> to vector<8x4xf32>
    %402 = arith.addf %399, %401 : vector<8x4xf32>
    %c0_87 = arith.constant 0 : index
    %c0_88 = arith.constant 0 : index
    %403 = vector.load %arg10[%c0_87, %c0_88] : memref<8x4xf32, #tpu.memory_space<vmem>>, vector<8x4xf32>
    tpu.vector_store %arg10[%c0_87, %c0_88], %402 {strides = array<i32>} : memref<8x4xf32, #tpu.memory_space<vmem>>, vector<8x4xf32>,
    return
  }
  func.func @transform_0(%arg0: i32) -> (i32, i32) {
    %c0_i32 = arith.constant 0 : i32
    %c0_i32_0 = arith.constant 0 : i32
    %c0_i32_1 = arith.constant 0 : i32
    return %c0_i32, %c0_i32_0 : i32, i32
  }
  func.func @transform_1(%arg0: i32) -> (i32, i32) {
    %c0_i32 = arith.constant 0 : i32
    %c0_i32_0 = arith.constant 0 : i32
    %c0_i32_1 = arith.constant 0 : i32
    return %c0_i32, %c0_i32_0 : i32, i32
  }
  func.func @transform_2(%arg0: i32) -> (i32, i32) {
    %c0_i32 = arith.constant 0 : i32
    %c0_i32_0 = arith.constant 0 : i32
    %c0_i32_1 = arith.constant 0 : i32
    return %c0_i32, %c0_i32_0 : i32, i32
  }
  func.func @transform_3(%arg0: i32) -> (i32, i32) {
    %c0_i32 = arith.constant 0 : i32
    %c0_i32_0 = arith.constant 0 : i32
    %c0_i32_1 = arith.constant 0 : i32
    return %c0_i32, %c0_i32_0 : i32, i32
  }
  func.func @transform_4(%arg0: i32) -> (i32, i32, i32) {
    %c0_i32 = arith.constant 0 : i32
    %c0_i32_0 = arith.constant 0 : i32
    %c0_i32_1 = arith.constant 0 : i32
    %c0_i32_2 = arith.constant 0 : i32
    return %c0_i32, %c0_i32_0, %c0_i32_1 : i32, i32, i32
  }
  func.func @transform_5(%arg0: i32) -> (i32, i32, i32) {
    %c0_i32 = arith.constant 0 : i32
    %c0_i32_0 = arith.constant 0 : i32
    %c0_i32_1 = arith.constant 0 : i32
    %c0_i32_2 = arith.constant 0 : i32
    return %c0_i32, %c0_i32_0, %c0_i32_1 : i32, i32, i32
  }
  func.func @transform_6(%arg0: i32) -> (i32, i32, i32) {
    %c0_i32 = arith.constant 0 : i32
    %c0_i32_0 = arith.constant 0 : i32
    %c0_i32_1 = arith.constant 0 : i32
    %c0_i32_2 = arith.constant 0 : i32
    return %c0_i32, %c0_i32_0, %c0_i32_1 : i32, i32, i32
  }
  func.func @transform_7(%arg0: i32) -> (i32, i32) {
    %c0_i32 = arith.constant 0 : i32
    %c0_i32_0 = arith.constant 0 : i32
    %c0_i32_1 = arith.constant 0 : i32
    return %c0_i32, %c0_i32_0 : i32, i32
  }
  func.func @transform_8(%arg0: i32) -> (i32, i32) {
    %c0_i32 = arith.constant 0 : i32
    %c0_i32_0 = arith.constant 0 : i32
    %c0_i32_1 = arith.constant 0 : i32
    return %c0_i32, %c0_i32_0 : i32, i32
  }
  func.func @transform_9(%arg0: i32) -> (i32, i32) {
    %c0_i32 = arith.constant 0 : i32
    %c0_i32_0 = arith.constant 0 : i32
    %c0_i32_1 = arith.constant 0 : i32
    return %c0_i32, %c0_i32_0 : i32, i32
  }
}

</mosaic_0001>

<bundles_post_ra>
// kernel: tpu_custom_call.1
= control target key start
LH: loop header
LB: loop body
LE: loop exit
PB: predicated region body
PF: predicated region fallthrough
CT: control target
= control target key end

     0   :  { %vm82_vm0 = vcmask 1041408   ;;  %vm69_vm1 = vcmask 31744   ;;  %v2291_v1 = vmov 0.0   ;;  %vm2292_vm2 = vmmov 0   ;;  %s2295_s20 = smov 64   ;;  %s2296_s21 = smov 32   ;;  %s2801_s1 = inlined_call_operand.vmem [shape: bf16[4,128], index: 1, kind: input, shape index: {}]   ;;  %s2802_s2 = inlined_call_operand.vmem [shape: bf16[32,128], index: 2, kind: input, shape index: {}]   ;;  %s2803_s0 = inlined_call_operand.vmem [shape: bf16[64,4], index: 0, kind: input, shape index: {}]   ;;  %s2804_s3 = inlined_call_operand.vmem [shape: f32[1,128], index: 3, kind: input, shape index: {}]   ;;  %s2805_s5 = inlined_call_operand.vmem [shape: bf16[1,32,128], index: 5, kind: input, shape index: {}]   ;;  %s2806_s4 = inlined_call_operand.vmem [shape: bf16[1,32,128], index: 4, kind: input, shape index: {}]   ;;  %s2807_s6 = inlined_call_operand.vmem [shape: f32[1,1,128], index: 6, kind: input, shape index: {}]   ;;  %s2808_s7 = inlined_call_operand.vmem [shape: f32[32,4], index: 7, kind: input, shape index: {}]   ;;  %s2809_s8 = inlined_call_operand.vmem [shape: f32[1,4], index: 8, kind: input, shape index: {}]   ;;  %s2810_s9 = inlined_call_operand.vmem [shape: f32[8,4], index: 9, kind: output, shape index: {}]  }
   0x1   :  { %v41_v0 = vld [vmem:[%s2801_s1] sm:$0x3]  ;;  %1960 = vmatprep.subr.bf16.mxu1 %v2291_v1  ;;  %1964 = vmatprep.mubr.msk.bf16.mxu1 %vm2292_vm2, %v2291_v1  ;;  %v2179_v5 = vld [vmem:[%s2803_s0 + $0x8] sm:$0xff]   ;;  %v2293_v7 = vmov 0   ;;  %v172_v20 = vlaneseq  ;;  %v2294_v24 = vmov 1.0   ;;  %v2183_v35 = vld [vmem:[%s2803_s0 + $0x10] sm:$0xff]  }
   0x2   :  { %2169 = vmatprep.subr.msk.bf16.mxu0 %vm82_vm0, %v41_v0  ;;  %v84_v2 = vsel %vm82_vm0, %v41_v0, 0  ;;  %v2357_v3 = vld [vmem:[%s2802_s2] sm:$0xff]   ;;  %v2372_v6 = vld [vmem:[%s2802_s2 + $0x8] sm:$0xff]   ;;  %v2185_v36 = vld [vmem:[%s2803_s0 + $0x18] sm:$0xff]   ;;  %vm191_vm6 = vcmask 261120  }
   0x3   :  { %1951 = vmatpush3.bf16.msra.mxu0 %v84_v2  ;;  %v2178_v4 = vld [vmem:[%s2803_s0] sm:$0xff]   ;;  %1961 = vmatpush3.bf16.msra.mxu1 %v2357_v3  ;;  %v173_v23 = vand.u32 127, %v172_v20  ;;  %v2424_v39 = vld [vmem:[%s2805_s5 + $0x8] sm:$0xff]  }
   0x4   :  { %1976 = vmatprep.subr.bf16.mxu0 %v2291_v1  ;;  %1952 = vmatprep.mubr.msk.bf16.mxu0 %vm69_vm1, %v2178_v4  ;;  %v2382_v8 = vld [vmem:[%s2804_s3] ss:$0 sm:$0xff]  ;;  %v2432_v40 = vld [vmem:[%s2806_s4 + $0x8] sm:$0xff]  }
   0x5   :  { %1962 = vmatprep.subr.bf16.mxu1 %v2291_v1  ;;  %vm174_vm3 = vcmp.ge.s32.totalorder %v173_v23, 64  ;;  %vm175_vm4 = vcmp.lt.s32.totalorder %v173_v23, 96  ;;  %v2412_v37 = vld [vmem:[%s2805_s5] sm:$0xff]  }
   0x6   :  { %1953 = vmatmul.mubr.msk.bf16.vlgmr.msra.gmra.mrb[0].mxu0 %vm69_vm1, %v2179_v5  ;;  %vm176_vm5 = vmand %vm174_vm3, %vm175_vm4  ;;  %v2417_v38 = vld [vmem:[%s2806_s4] sm:$0xff]  }
   0x7   :  { %1963 = vmatpush3.bf16.msra.mxu1 %v2372_v6  ;;  %v2391_v25 = vsel %vm176_vm5, 2.0, %v2294_v24  ;;  %v2394_v27 = vsel %vm176_vm5, -1.0, %v2291_v1  ;;  %1956 = vmatprep.mubr.msk.bf16.mxu0 %vm69_vm1, %v2183_v35  ;;  %v2476_v55 = vld [vmem:[%s2807_s6] ss:$0 sm:$0xff] }
   0x8   :  { %1968 = vmatprep.subr.bf16.mxu1 %v2291_v1  ;;  %1977 = vmatpush3.bf16.msra.mxu0 %v2417_v38 }
   0x9   :  { %1978 = vmatprep.subr.bf16.mxu0 %v2291_v1 }
   0xa   :  { %1965 = vmatmul.mubr.bf16.vlgmr.msra.gmra.mrb[0].mxu1 %v2293_v7 }
   0xb   :  { %1972 = vmatprep.mubr.msk.bf16.mxu1 %vm2292_vm2, %v2291_v1  ;;  %1969 = vmatpush3.bf16.msra.mxu1 %v2412_v37 }
   0xc   :  { %1970 = vmatprep.subr.bf16.mxu1 %v2291_v1  ;;  %1979 = vmatpush3.bf16.msra.mxu0 %v2432_v40 }
   0xd   :  { %1992 = vmatprep.subr.bf16.mxu0 %v2291_v1 }
   0xe   :  { %1957 = vmatmul.mubr.msk.bf16.gmra.mrb[4].mxu0 %vm69_vm1, %v2185_v36 }
   0xf   :  { %1980 = vmatprep.mubr.msk.bf16.mxu0 %vm2292_vm2, %v2291_v1  ;;  %1971 = vmatpush3.bf16.msra.mxu1 %v2424_v39 }
  0x10   :  { %1984 = vmatprep.subr.bf16.mxu1 %v2291_v1 }
  0x12   :  { %1973 = vmatmul.mubr.bf16.vlgmr.msra.gmra.mrb[4].mxu1 %v2293_v7 }
  0x13   :  { %1985 = vmatpush3.bf16.msra.mxu1 %v2357_v3  ;;  %1988 = vmatprep.mubr.msk.bf16.mxu1 %vm2292_vm2, %v2291_v1 }
  0x14   :  { %1986 = vmatprep.subr.bf16.mxu1 %v2291_v1 }
  0x17   :  { %1987 = vmatpush3.bf16.msra.mxu1 %v2372_v6 }
  0x18   :  { %2000 = vmatprep.subr.bf16.mxu1 %v2291_v1 }
  0xd9   :  { %v2384_v9 = vpop.f32.mrb[0].mxu0 }
  0xda   :  { %v120_v10 = vpop.f32.mrb[1].mxu0 }
  0xdb   :  { %v121_v11 = vadd.f32 %v2382_v8, %v120_v10  ;;  %v2387_v12 = vpop.f32.mrb[2].mxu0 }
  0xdc   :  { %v2389_v13 = vpop.f32.mrb[3].mxu0 }
  0xdd   :  { %v229_v14 = vpop.f32.mrb[0].mxu1  ;;  %v124_v54 = vadd.f32 %v2382_v8, %v2389_v13 }
  0xde   :  { %v288_v15 = vadd.f32 %v229_v14, %v121_v11  ;;  %v1966_v16 = vpop.f32.mrb[1].mxu1 }
  0xdf   :  { %v232_v17 = vpop.f32.mrb[2].mxu1 }
  0xe0   :  { %v1825_v18 = vmul.f32 -1.442695, %v288_v15  ;;  %v1967_v19 = vpop.f32.mrb[3].mxu1 }
  0xe1   :  { %v2449_v45 = vpop.f32.mrb[4].mxu0 }
  0xe2   :  { %2187 = vpow2.f32 %v1825_v18  ;;  %v2451_v46 = vpop.f32.mrb[5].mxu0 }
  0xe3   :  { %v2453_v47 = vpop.f32.mrb[6].mxu0 }
  0xe4   :  { %v2455_v48 = vpop.f32.mrb[7].mxu0 }
  0xe5   :  { %v281_v49 = vpop.f32.mrb[4].mxu1 }
  0xe6   :  { %v1974_v50 = vpop.f32.mrb[5].mxu1 }
  0xe7   :  { %v284_v51 = vpop.f32.mrb[6].mxu1 }
  0xe8   :  { %v1975_v52 = vpop.f32.mrb[7].mxu1 }
  0xec   :  { %v2188_v21 = vpop.eup %2187 }
  0xed   :  { %v292_v22 = vadd.f32 1.0, %v2188_v21 }
  0xef   :  { %2189 = vrcp.f32 %v292_v22 }
  0xf9   :  { %v2190_v26 = vpop.eup %2189 }
  0xfa   :  { %v295_v28 = vmul.f32 %v2190_v26, %v2391_v25 }
  0xfc   :  { %v296_v29 = vadd.f32 %v295_v28, %v2394_v27 }
  0xfe   :  { %299 = vrot.lane.b32.xlu0 %v296_v29, %s2295_s20  ;;  %v297_v32 = vmul.f32 0.0, %v296_v29 }
 0x170   :  { %v300_v30 = vpop.permute.xlu0 %299 }
 0x171   :  { %v302_v31 = vmul.f32 %v300_v30, %v296_v29 }
 0x173   :  { %304 = vrot.lane.b32.xlu0 %v302_v31, %s2296_s21 }
 0x1e5   :  { %v305_v33 = vpop.permute.xlu0 %304 }
 0x1e6   :  { %v2400_v34 = vadd.f32 %v305_v33, %v297_v32 }
 0x1e8   :  { %2191 = vtanh.f32 %v2400_v34 }
 0x1f2   :  { %v2192_v41 = vpop.eup %2191 }
 0x1f3   :  { %310 = vrot.lane.b32.xlu1 %v2192_v41, %s2295_s20 }
 0x265   :  { %v311_v42 = vpop.permute.xlu1 %310 }
 0x266   :  { %v313_v43 = vmul.f32 %v311_v42, %v296_v29 }
 0x268   :  { %v314_v44 = vpack.c.bf16 %v313_v43, %v313_v43 }
 0x26a   :  { %316 = vrot.lane.b32.xlu1 %v314_v44, %s2296_s21 }
 0x2dc   :  { %v317_v53 = vpop.permute.xlu1 %316 }
 0x2dd   :  { %1981 = vmatmul.mubr.msk.bf16.vlgmr.msra.gmra.mrb[8].mxu0 %vm191_vm6, %v317_v53  ;;  %1989 = vmatmul.mubr.msk.bf16.vlgmr.msra.gmra.mrb[8].mxu1 %vm191_vm6, %v317_v53 }
 0x2de   :  { %2001 = vmatpush3.bf16.msra.mxu1 %v2417_v38  ;;  %1993 = vmatpush3.bf16.msra.mxu0 %v2412_v37 }
 0x2df   :  { %2002 = vmatprep.subr.bf16.mxu1 %v2291_v1  ;;  %1994 = vmatprep.subr.bf16.mxu0 %v2291_v1 }
 0x2e0   :  { %2004 = vmatprep.mubr.msk.bf16.mxu1 %vm2292_vm2, %v2291_v1  ;;  %1996 = vmatprep.mubr.msk.bf16.mxu0 %vm2292_vm2, %v2291_v1 }
 0x2e2   :  { %2003 = vmatpush3.bf16.msra.mxu1 %v2432_v40  ;;  %1995 = vmatpush3.bf16.msra.mxu0 %v2424_v39 }
 0x2e3   :  { %2008 = vmatprep.subr.bf16.mxu0 %v2291_v1  ;;  %2016 = vmatprep.subr.bf16.mxu1 %v2291_v1 }
 0x3b0   :  { %v367_v56 = vpop.f32.mrb[8].mxu0  ;;  %v439_v57 = vpop.f32.mrb[8].mxu1 }
 0x3b1   :  { %v368_v58 = vadd.f32 %v367_v56, %v281_v49  ;;  %v494_v59 = vadd.f32 %v439_v57, %v124_v54  ;;  %v1982_v60 = vpop.f32.mrb[9].mxu0  ;;  %v1990_v61 = vpop.f32.mrb[9].mxu1 }
 0x3b2   :  { %v370_v62 = vpop.f32.mrb[10].mxu0  ;;  %v442_v63 = vpop.f32.mrb[10].mxu1 }
 0x3b3   :  { %v379_v0 = vadd.f32 %v2476_v55, %v368_v58  ;;  %v1833_v2 = vmul.f32 -1.442695, %v494_v59  ;;  %v1983_v4 = vpop.f32.mrb[11].mxu0  ;;  %v1991_v5 = vpop.f32.mrb[11].mxu1  ;;  %v129_v63 = vadd.f32 %v2384_v9, %v2382_v8 }
 0x3b5   :  { %v1830_v7 = vmul.f32 -1.442695, %v379_v0  ;;  %2193 = vpow2.f32 %v1833_v2 }
 0x3b7   :  { %2195 = vpow2.f32 %v1830_v7 }
 0x3bf   :  { %v2194_v10 = vpop.eup %2193 }
 0x3c0   :  { %v498_v11 = vadd.f32 1.0, %v2194_v10 }
 0x3c1   :  { %v2196_v13 = vpop.eup %2195 }
 0x3c2   :  { %v383_v14 = vadd.f32 1.0, %v2196_v13  ;;  %2197 = vrcp.f32 %v498_v11 }
 0x3c4   :  { %2199 = vrcp.f32 %v383_v14 }
 0x3cc   :  { %v2198_v15 = vpop.eup %2197 }
 0x3cd   :  { %v501_v16 = vmul.f32 %v2198_v15, %v2391_v25 }
 0x3ce   :  { %v2200_v17 = vpop.eup %2199 }
 0x3cf   :  { %v502_v18 = vadd.f32 %v501_v16, %v2394_v27  ;;  %v386_v19 = vmul.f32 %v2200_v17, %v2391_v25 }
 0x3d1   :  { %505 = vrot.lane.b32.xlu1 %v502_v18, %s2295_s20  ;;  %v387_v20 = vadd.f32 %v386_v19, %v2394_v27  ;;  %v503_v26 = vmul.f32 %v502_v18, %v2400_v34 }
 0x3d3   :  { %390 = vrot.lane.b32.xlu0 %v387_v20, %s2295_s20  ;;  %v388_v30 = vmul.f32 0.0, %v387_v20 }
 0x443   :  { %v506_v21 = vpop.permute.xlu1 %505 }
 0x444   :  { %v508_v22 = vmul.f32 %v506_v21, %v502_v18 }
 0x445   :  { %v391_v23 = vpop.permute.xlu0 %390 }
 0x446   :  { %v393_v24 = vmul.f32 %v391_v23, %v387_v20  ;;  %510 = vrot.lane.b32.xlu1 %v508_v22, %s2296_s21 }
 0x448   :  { %395 = vrot.lane.b32.xlu0 %v393_v24, %s2296_s21 }
 0x4b8   :  { %v511_v28 = vpop.permute.xlu1 %510 }
 0x4b9   :  { %v2488_v29 = vadd.f32 %v511_v28, %v503_v26 }
 0x4ba   :  { %v396_v31 = vpop.permute.xlu0 %395 }
 0x4bb   :  { %2201 = vtanh.f32 %v2488_v29  ;;  %v2491_v32 = vadd.f32 %v396_v31, %v388_v30 }
 0x4bd   :  { %2203 = vtanh.f32 %v2491_v32 }
 0x4c5   :  { %v2202_v33 = vpop.eup %2201 }
 0x4c6   :  { %516 = vrot.lane.b32.xlu1 %v2202_v33, %s2295_s20 }
 0x4c7   :  { %v2204_v35 = vpop.eup %2203 }
 0x4c8   :  { %401 = vrot.lane.b32.xlu0 %v2204_v35, %s2295_s20 }
 0x538   :  { %v517_v36 = vpop.permute.xlu1 %516 }
 0x539   :  { %v519_v41 = vmul.f32 %v517_v36, %v502_v18 }
 0x53a   :  { %v402_v34 = vpop.permute.xlu0 %401 }
 0x53b   :  { %v520_v42 = vpack.c.bf16 %v519_v41, %v519_v41  ;;  %v404_v43 = vmul.f32 %v402_v34, %v387_v20 }
 0x53d   :  { %v445_v44 = vpack.c.bf16 %v404_v43, %v404_v43  ;;  %522 = vrot.lane.b32.xlu1 %v520_v42, %s2296_s21 }
 0x53f   :  { %447 = vrot.lane.b32.xlu0 %v445_v44, %s2296_s21 }
 0x5af   :  { %v523_v49 = vpop.permute.xlu1 %522 }
 0x5b0   :  { %2005 = vmatmul.mubr.msk.bf16.vlgmr.msra.gmra.mrb[12].mxu1 %vm191_vm6, %v523_v49 }
 0x5b1   :  { %v448_v50 = vpop.permute.xlu0 %447  ;;  %2017 = vmatpush3.bf16.msra.mxu1 %v2412_v37  ;;  %2020 = vmatprep.mubr.msk.bf16.mxu1 %vm2292_vm2, %v2291_v1 }
 0x5b2   :  { %1997 = vmatmul.mubr.msk.bf16.vlgmr.msra.gmra.mrb[12].mxu0 %vm191_vm6, %v448_v50  ;;  %2018 = vmatprep.subr.bf16.mxu1 %v2291_v1 }
 0x5b3   :  { %2009 = vmatpush3.bf16.msra.mxu0 %v2357_v3  ;;  %2012 = vmatprep.mubr.msk.bf16.mxu0 %vm2292_vm2, %v2291_v1 }
 0x5b4   :  { %2010 = vmatprep.subr.bf16.mxu0 %v2291_v1 }
 0x5b5   :  { %2019 = vmatpush3.bf16.msra.mxu1 %v2424_v39 }
 0x5b6   :  { %2032 = vmatprep.subr.bf16.mxu1 %v2291_v1 }
 0x5b7   :  { %2011 = vmatpush3.bf16.msra.mxu0 %v2372_v6 }
 0x5b8   :  { %2024 = vmatprep.subr.bf16.mxu0 %v2291_v1 }
 0x5ba   :  { %2013 = vmatmul.mubr.msk.bf16.vlgmr.msra.gmra.mrb[16].mxu0 %vm191_vm6, %v523_v49 }
 0x5bb   :  { %2025 = vmatpush3.bf16.msra.mxu0 %v2417_v38  ;;  %2028 = vmatprep.mubr.msk.bf16.mxu0 %vm2292_vm2, %v2291_v1 }
 0x5bc   :  { %2026 = vmatprep.subr.bf16.mxu0 %v2291_v1 }
 0x5bf   :  { %2027 = vmatpush3.bf16.msra.mxu0 %v2432_v40 }
 0x5c0   :  { %2040 = vmatprep.subr.bf16.mxu0 %v2291_v1 }
 0x683   :  { %v561_v51 = vpop.f32.mrb[12].mxu1 }
 0x684   :  { %v2006_v52 = vpop.f32.mrb[13].mxu1 }
 0x685   :  { %v486_v53 = vpop.f32.mrb[12].mxu0  ;;  %v564_v54 = vpop.f32.mrb[14].mxu1 }
 0x686   :  { %v562_v56 = vadd.f32 %v561_v51, %v486_v53  ;;  %v1998_v57 = vpop.f32.mrb[13].mxu0  ;;  %v2007_v58 = vpop.f32.mrb[15].mxu1 }
 0x687   :  { %v489_v59 = vpop.f32.mrb[14].mxu0  ;;  %v132_v57 = vadd.f32 %v2387_v12, %v2382_v8 }
 0x688   :  { %v567_v60 = vadd.f32 %v2476_v55, %v562_v56  ;;  %v1999_v61 = vpop.f32.mrb[15].mxu0 }
 0x68a   :  { %v1835_v62 = vmul.f32 -1.442695, %v567_v60 }
 0x68c   :  { %2205 = vpow2.f32 %v1835_v62 }
 0x68d   :  { %v627_v0 = vpop.f32.mrb[16].mxu0 }
 0x68e   :  { %v682_v2 = vadd.f32 %v627_v0, %v129_v63  ;;  %v2014_v4 = vpop.f32.mrb[17].mxu0 }
 0x68f   :  { %v630_v5 = vpop.f32.mrb[18].mxu0 }
 0x690   :  { %v1838_v7 = vmul.f32 -1.442695, %v682_v2  ;;  %v2015_v10 = vpop.f32.mrb[19].mxu0 }
 0x692   :  { %2207 = vpow2.f32 %v1838_v7 }
 0x696   :  { %v2206_v11 = vpop.eup %2205 }
 0x697   :  { %v571_v13 = vadd.f32 1.0, %v2206_v11 }
 0x699   :  { %2209 = vrcp.f32 %v571_v13 }
 0x69c   :  { %v2208_v14 = vpop.eup %2207 }
 0x69d   :  { %v686_v15 = vadd.f32 1.0, %v2208_v14 }
 0x69f   :  { %2211 = vrcp.f32 %v686_v15 }
 0x6a3   :  { %v2210_v16 = vpop.eup %2209 }
 0x6a4   :  { %v574_v17 = vmul.f32 %v2210_v16, %v2391_v25 }
 0x6a6   :  { %v575_v18 = vadd.f32 %v574_v17, %v2394_v27 }
 0x6a8   :  { %578 = vrot.lane.b32.xlu0 %v575_v18, %s2295_s20  ;;  %v576_v26 = vmul.f32 %v575_v18, %v2491_v32 }
 0x6a9   :  { %v2212_v9 = vpop.eup %2211 }
 0x6aa   :  { %v689_v19 = vmul.f32 %v2212_v9, %v2391_v25 }
 0x6ac   :  { %v690_v20 = vadd.f32 %v689_v19, %v2394_v27 }
 0x6ae   :  { %693 = vrot.lane.b32.xlu1 %v690_v20, %s2295_s20  ;;  %v691_v31 = vmul.f32 %v690_v20, %v2488_v29 }
 0x71a   :  { %v579_v21 = vpop.permute.xlu0 %578 }
 0x71b   :  { %v581_v22 = vmul.f32 %v579_v21, %v575_v18 }
 0x71d   :  { %583 = vrot.lane.b32.xlu0 %v581_v22, %s2296_s21 }
 0x720   :  { %v694_v23 = vpop.permute.xlu1 %693 }
 0x721   :  { %v696_v24 = vmul.f32 %v694_v23, %v690_v20 }
 0x723   :  { %698 = vrot.lane.b32.xlu1 %v696_v24, %s2296_s21 }
 0x78f   :  { %v584_v28 = vpop.permute.xlu0 %583 }
 0x790   :  { %v2531_v30 = vadd.f32 %v584_v28, %v576_v26 }
 0x792   :  { %2213 = vtanh.f32 %v2531_v30 }
 0x795   :  { %v699_v33 = vpop.permute.xlu1 %698 }
 0x796   :  { %v2535_v35 = vadd.f32 %v699_v33, %v691_v31 }
 0x798   :  { %2215 = vtanh.f32 %v2535_v35 }
 0x79c   :  { %v2214_v36 = vpop.eup %2213 }
 0x79d   :  { %589 = vrot.lane.b32.xlu0 %v2214_v36, %s2295_s20 }
 0x7a2   :  { %v2216_v41 = vpop.eup %2215 }
 0x7a3   :  { %704 = vrot.lane.b32.xlu1 %v2216_v41, %s2295_s20 }
 0x80f   :  { %v590_v34 = vpop.permute.xlu0 %589 }
 0x810   :  { %v592_v32 = vmul.f32 %v590_v34, %v575_v18 }
 0x812   :  { %v633_v42 = vpack.c.bf16 %v592_v32, %v592_v32 }
 0x814   :  { %635 = vrot.lane.b32.xlu0 %v633_v42, %s2296_s21 }
 0x815   :  { %v705_v43 = vpop.permute.xlu1 %704 }
 0x816   :  { %v707_v44 = vmul.f32 %v705_v43, %v690_v20 }
 0x818   :  { %v708_v49 = vpack.c.bf16 %v707_v44, %v707_v44 }
 0x81a   :  { %710 = vrot.lane.b32.xlu1 %v708_v49, %s2296_s21 }
 0x886   :  { %v636_v29 = vpop.permute.xlu0 %635 }
 0x887   :  { %2021 = vmatmul.mubr.msk.bf16.vlgmr.msra.gmra.mrb[16].mxu1 %vm191_vm6, %v636_v29 }
 0x888   :  { %2033 = vmatpush3.bf16.msra.mxu1 %v2357_v3  ;;  %2036 = vmatprep.mubr.msk.bf16.mxu1 %vm2292_vm2, %v2291_v1 }
 0x889   :  { %2034 = vmatprep.subr.bf16.mxu1 %v2291_v1 }
 0x88c   :  { %2035 = vmatpush3.bf16.msra.mxu1 %v2372_v6  ;;  %v711_v50 = vpop.permute.xlu1 %710 }
 0x88d   :  { %2029 = vmatmul.mubr.msk.bf16.vlgmr.msra.gmra.mrb[20].mxu0 %vm191_vm6, %v711_v50  ;;  %2048 = vmatprep.subr.bf16.mxu1 %v2291_v1 }
 0x88e   :  { %2041 = vmatpush3.bf16.msra.mxu0 %v2412_v37  ;;  %2044 = vmatprep.mubr.msk.bf16.mxu0 %vm2292_vm2, %v2291_v1 }
 0x88f   :  { %2037 = vmatmul.mubr.msk.bf16.vlgmr.msra.gmra.mrb[20].mxu1 %vm191_vm6, %v711_v50  ;;  %2042 = vmatprep.subr.bf16.mxu0 %v2291_v1 }
 0x890   :  { %2049 = vmatpush3.bf16.msra.mxu1 %v2417_v38  ;;  %2052 = vmatprep.mubr.msk.bf16.mxu1 %vm2292_vm2, %v2291_v1 }
 0x891   :  { %2050 = vmatprep.subr.bf16.mxu1 %v2291_v1 }
 0x892   :  { %2043 = vmatpush3.bf16.msra.mxu0 %v2424_v39 }
 0x893   :  { %2056 = vmatprep.subr.bf16.mxu0 %v2291_v1 }
 0x894   :  { %2051 = vmatpush3.bf16.msra.mxu1 %v2432_v40 }
 0x895   :  { %2064 = vmatprep.subr.bf16.mxu1 %v2291_v1 }
 0x95a   :  { %v674_v51 = vpop.f32.mrb[16].mxu1 }
 0x95b   :  { %v2022_v52 = vpop.f32.mrb[17].mxu1 }
 0x95c   :  { %v677_v53 = vpop.f32.mrb[18].mxu1 }
 0x95d   :  { %v2023_v54 = vpop.f32.mrb[19].mxu1 }
 0x960   :  { %v749_v56 = vpop.f32.mrb[20].mxu0 }
 0x961   :  { %v750_v58 = vadd.f32 %v749_v56, %v674_v51  ;;  %v2030_v59 = vpop.f32.mrb[21].mxu0 }
 0x962   :  { %v752_v60 = vpop.f32.mrb[22].mxu0  ;;  %v815_v61 = vpop.f32.mrb[20].mxu1 }
 0x963   :  { %v755_v62 = vadd.f32 %v2476_v55, %v750_v58  ;;  %v870_v63 = vadd.f32 %v815_v61, %v132_v57  ;;  %v2031_v0 = vpop.f32.mrb[23].mxu0  ;;  %v2038_v2 = vpop.f32.mrb[21].mxu1 }
 0x964   :  { %v818_v4 = vpop.f32.mrb[22].mxu1 }
 0x965   :  { %v1840_v5 = vmul.f32 -1.442695, %v755_v62  ;;  %v1843_v7 = vmul.f32 -1.442695, %v870_v63  ;;  %v2039_v10 = vpop.f32.mrb[23].mxu1  ;;  %v137_v62 = vadd.f32 %v2382_v8, %v2451_v46 }
 0x967   :  { %2217 = vpow2.f32 %v1840_v5 }
 0x968   :  { %2219 = vpow2.f32 %v1843_v7 }
 0x971   :  { %v2218_v11 = vpop.eup %2217 }
 0x972   :  { %v2220_v13 = vpop.eup %2219  ;;  %v759_v14 = vadd.f32 1.0, %v2218_v11 }
 0x973   :  { %v874_v15 = vadd.f32 1.0, %v2220_v13 }
 0x974   :  { %2221 = vrcp.f32 %v759_v14 }
 0x975   :  { %2223 = vrcp.f32 %v874_v15 }
 0x97e   :  { %v2222_v12 = vpop.eup %2221 }
 0x97f   :  { %v2224_v16 = vpop.eup %2223  ;;  %v762_v17 = vmul.f32 %v2222_v12, %v2391_v25 }
 0x980   :  { %v877_v18 = vmul.f32 %v2224_v16, %v2391_v25 }
 0x981   :  { %v763_v9 = vadd.f32 %v762_v17, %v2394_v27 }
 0x982   :  { %v878_v19 = vadd.f32 %v877_v18, %v2394_v27 }
 0x983   :  { %766 = vrot.lane.b32.xlu0 %v763_v9, %s2295_s20  ;;  %v764_v24 = vmul.f32 %v763_v9, %v2531_v30 }
 0x984   :  { %881 = vrot.lane.b32.xlu1 %v878_v19, %s2295_s20  ;;  %v879_v26 = vmul.f32 %v878_v19, %v2535_v35 }
 0x9f5   :  { %v767_v20 = vpop.permute.xlu0 %766 }
 0x9f6   :  { %v882_v21 = vpop.permute.xlu1 %881  ;;  %v769_v22 = vmul.f32 %v767_v20, %v763_v9 }
 0x9f7   :  { %v884_v23 = vmul.f32 %v882_v21, %v878_v19 }
 0x9f8   :  { %771 = vrot.lane.b32.xlu0 %v769_v22, %s2296_s21 }
 0x9f9   :  { %886 = vrot.lane.b32.xlu1 %v884_v23, %s2296_s21 }
 0xa6a   :  { %v772_v28 = vpop.permute.xlu0 %771 }
 0xa6b   :  { %v887_v31 = vpop.permute.xlu1 %886  ;;  %v2576_v33 = vadd.f32 %v772_v28, %v764_v24 }
 0xa6c   :  { %v2578_v36 = vadd.f32 %v887_v31, %v879_v26 }
 0xa6d   :  { %2225 = vtanh.f32 %v2576_v33 }
 0xa6e   :  { %2227 = vtanh.f32 %v2578_v36 }
 0xa77   :  { %v2226_v41 = vpop.eup %2225 }
 0xa78   :  { %v2228_v34 = vpop.eup %2227  ;;  %777 = vrot.lane.b32.xlu0 %v2226_v41, %s2295_s20 }
 0xa79   :  { %892 = vrot.lane.b32.xlu1 %v2228_v34, %s2295_s20 }
 0xaea   :  { %v778_v32 = vpop.permute.xlu0 %777 }
 0xaeb   :  { %v893_v30 = vpop.permute.xlu1 %892  ;;  %v780_v42 = vmul.f32 %v778_v32, %v763_v9 }
 0xaec   :  { %v895_v35 = vmul.f32 %v893_v30, %v878_v19 }
 0xaed   :  { %v821_v43 = vpack.c.bf16 %v780_v42, %v780_v42 }
 0xaee   :  { %v896_v44 = vpack.c.bf16 %v895_v35, %v895_v35 }
 0xaef   :  { %823 = vrot.lane.b32.xlu0 %v821_v43, %s2296_s21 }
 0xaf0   :  { %898 = vrot.lane.b32.xlu1 %v896_v44, %s2296_s21 }
 0xb61   :  { %v824_v49 = vpop.permute.xlu0 %823 }
 0xb62   :  { %v899_v29 = vpop.permute.xlu1 %898  ;;  %2045 = vmatmul.mubr.msk.bf16.vlgmr.msra.gmra.mrb[24].mxu0 %vm191_vm6, %v824_v49 }
 0xb63   :  { %2053 = vmatmul.mubr.msk.bf16.vlgmr.msra.gmra.mrb[24].mxu1 %vm191_vm6, %v899_v29  ;;  %2057 = vmatpush3.bf16.msra.mxu0 %v2357_v3 }
 0xb64   :  { %2058 = vmatprep.subr.bf16.mxu0 %v2291_v1  ;;  %2060 = vmatprep.mubr.msk.bf16.mxu0 %vm2292_vm2, %v2291_v1 }
 0xb65   :  { %2065 = vmatpush3.bf16.msra.mxu1 %v2412_v37  ;;  %2068 = vmatprep.mubr.msk.bf16.mxu1 %vm2292_vm2, %v2291_v1 }
 0xb66   :  { %2066 = vmatprep.subr.bf16.mxu1 %v2291_v1 }
 0xb67   :  { %2059 = vmatpush3.bf16.msra.mxu0 %v2372_v6 }
 0xb68   :  { %2072 = vmatprep.subr.bf16.mxu0 %v2291_v1 }
 0xb69   :  { %2067 = vmatpush3.bf16.msra.mxu1 %v2424_v39 }
 0xb6a   :  { %2061 = vmatmul.mubr.msk.bf16.vlgmr.msra.gmra.mrb[28].mxu0 %vm191_vm6, %v899_v29  ;;  %2080 = vmatprep.subr.bf16.mxu1 %v2291_v1 }
 0xb6b   :  { %2073 = vmatpush3.bf16.msra.mxu0 %v2417_v38  ;;  %2076 = vmatprep.mubr.msk.bf16.mxu0 %vm2292_vm2, %v2291_v1 }
 0xb6c   :  { %2074 = vmatprep.subr.bf16.mxu0 %v2291_v1 }
 0xb6f   :  { %2075 = vmatpush3.bf16.msra.mxu0 %v2432_v40 }
 0xb70   :  { %2088 = vmatprep.subr.bf16.mxu0 %v2291_v1 }
 0xc35   :  { %v862_v50 = vpop.f32.mrb[24].mxu0 }
 0xc36   :  { %v937_v51 = vpop.f32.mrb[24].mxu1  ;;  %v2046_v52 = vpop.f32.mrb[25].mxu0 }
 0xc37   :  { %v938_v53 = vadd.f32 %v937_v51, %v862_v50  ;;  %v2054_v54 = vpop.f32.mrb[25].mxu1  ;;  %v865_v56 = vpop.f32.mrb[26].mxu0 }
 0xc38   :  { %v940_v57 = vpop.f32.mrb[26].mxu1  ;;  %v2047_v58 = vpop.f32.mrb[27].mxu0  ;;  %v140_v56 = vadd.f32 %v2382_v8, %v2455_v48 }
 0xc39   :  { %v943_v59 = vadd.f32 %v2476_v55, %v938_v53  ;;  %v2055_v60 = vpop.f32.mrb[27].mxu1 }
 0xc3b   :  { %v1845_v61 = vmul.f32 -1.442695, %v943_v59 }
 0xc3d   :  { %2229 = vpow2.f32 %v1845_v61  ;;  %v1003_v63 = vpop.f32.mrb[28].mxu0 }
 0xc3e   :  { %v1058_v0 = vadd.f32 %v1003_v63, %v137_v62  ;;  %v2062_v2 = vpop.f32.mrb[29].mxu0 }
 0xc3f   :  { %v1006_v4 = vpop.f32.mrb[30].mxu0 }
 0xc40   :  { %v1848_v5 = vmul.f32 -1.442695, %v1058_v0  ;;  %v2063_v7 = vpop.f32.mrb[31].mxu0 }
 0xc42   :  { %2231 = vpow2.f32 %v1848_v5 }
 0xc47   :  { %v2230_v10 = vpop.eup %2229 }
 0xc48   :  { %v947_v11 = vadd.f32 1.0, %v2230_v10 }
 0xc4a   :  { %2233 = vrcp.f32 %v947_v11 }
 0xc4c   :  { %v2232_v13 = vpop.eup %2231 }
 0xc4d   :  { %v1062_v14 = vadd.f32 1.0, %v2232_v13 }
 0xc4f   :  { %2235 = vrcp.f32 %v1062_v14 }
 0xc54   :  { %v2234_v15 = vpop.eup %2233 }
 0xc55   :  { %v950_v12 = vmul.f32 %v2234_v15, %v2391_v25 }
 0xc57   :  { %v951_v16 = vadd.f32 %v950_v12, %v2394_v27 }
 0xc59   :  { %v2236_v46 = vpop.eup %2235  ;;  %954 = vrot.lane.b32.xlu0 %v951_v16, %s2295_s20  ;;  %v952_v22 = vmul.f32 %v951_v16, %v2576_v33 }
 0xc5a   :  { %v1065_v17 = vmul.f32 %v2236_v46, %v2391_v25 }
 0xc5c   :  { %v1066_v18 = vadd.f32 %v1065_v17, %v2394_v27 }
 0xc5e   :  { %1069 = vrot.lane.b32.xlu1 %v1066_v18, %s2295_s20  ;;  %v1067_v26 = vmul.f32 %v1066_v18, %v2578_v36 }
 0xccb   :  { %v955_v9 = vpop.permute.xlu0 %954 }
 0xccc   :  { %v957_v19 = vmul.f32 %v955_v9, %v951_v16 }
 0xcce   :  { %959 = vrot.lane.b32.xlu0 %v957_v19, %s2296_s21 }
 0xcd0   :  { %v1070_v20 = vpop.permute.xlu1 %1069 }
 0xcd1   :  { %v1072_v21 = vmul.f32 %v1070_v20, %v1066_v18 }
 0xcd3   :  { %1074 = vrot.lane.b32.xlu1 %v1072_v21, %s2296_s21 }
 0xd40   :  { %v960_v23 = vpop.permute.xlu0 %959 }
 0xd41   :  { %v2619_v24 = vadd.f32 %v960_v23, %v952_v22 }
 0xd43   :  { %2237 = vtanh.f32 %v2619_v24 }
 0xd45   :  { %v1075_v28 = vpop.permute.xlu1 %1074 }
 0xd46   :  { %v2623_v31 = vadd.f32 %v1075_v28, %v1067_v26 }
 0xd48   :  { %2239 = vtanh.f32 %v2623_v31 }
 0xd4d   :  { %v2238_v41 = vpop.eup %2237 }
 0xd4e   :  { %965 = vrot.lane.b32.xlu0 %v2238_v41, %s2295_s20 }
 0xd52   :  { %v2240_v34 = vpop.eup %2239 }
 0xd53   :  { %1080 = vrot.lane.b32.xlu1 %v2240_v34, %s2295_s20 }
 0xdc0   :  { %v966_v32 = vpop.permute.xlu0 %965 }
 0xdc1   :  { %v968_v33 = vmul.f32 %v966_v32, %v951_v16 }
 0xdc3   :  { %v1009_v30 = vpack.c.bf16 %v968_v33, %v968_v33 }
 0xdc5   :  { %1011 = vrot.lane.b32.xlu0 %v1009_v30, %s2296_s21  ;;  %v1081_v42 = vpop.permute.xlu1 %1080 }
 0xdc6   :  { %v1083_v35 = vmul.f32 %v1081_v42, %v1066_v18 }
 0xdc8   :  { %v1084_v43 = vpack.c.bf16 %v1083_v35, %v1083_v35 }
 0xdca   :  { %1086 = vrot.lane.b32.xlu1 %v1084_v43, %s2296_s21 }
 0xe37   :  { %v1012_v36 = vpop.permute.xlu0 %1011 }
 0xe38   :  { %2069 = vmatmul.mubr.msk.bf16.vlgmr.msra.gmra.mrb[28].mxu1 %vm191_vm6, %v1012_v36 }
 0xe39   :  { %2081 = vmatpush3.bf16.msra.mxu1 %v2357_v3  ;;  %2084 = vmatprep.mubr.msk.bf16.mxu1 %vm2292_vm2, %v2291_v1 }
 0xe3a   :  { %2082 = vmatprep.subr.bf16.mxu1 %v2291_v1 }
 0xe3c   :  { %v1087_v44 = vpop.permute.xlu1 %1086 }
 0xe3d   :  { %2083 = vmatpush3.bf16.msra.mxu1 %v2372_v6  ;;  %2077 = vmatmul.mubr.msk.bf16.vlgmr.msra.gmra.mrb[32].mxu0 %vm191_vm6, %v1087_v44 }
 0xe3e   :  { %2096 = vmatprep.subr.bf16.mxu1 %v2291_v1  ;;  %2089 = vmatpush3.bf16.msra.mxu0 %v2412_v37 }
 0xe3f   :  { %2090 = vmatprep.subr.bf16.mxu0 %v2291_v1  ;;  %2092 = vmatprep.mubr.msk.bf16.mxu0 %vm2292_vm2, %v2291_v1 }
 0xe40   :  { %2085 = vmatmul.mubr.msk.bf16.vlgmr.msra.gmra.mrb[32].mxu1 %vm191_vm6, %v1087_v44 }
 0xe41   :  { %2097 = vmatpush3.bf16.msra.mxu1 %v2417_v38  ;;  %2100 = vmatprep.mubr.msk.bf16.mxu1 %vm2292_vm2, %v2291_v1 }
 0xe42   :  { %2098 = vmatprep.subr.bf16.mxu1 %v2291_v1  ;;  %2091 = vmatpush3.bf16.msra.mxu0 %v2424_v39 }
 0xe43   :  { %2104 = vmatprep.subr.bf16.mxu0 %v2291_v1 }
 0xe45   :  { %2099 = vmatpush3.bf16.msra.mxu1 %v2432_v40 }
 0xe46   :  { %2112 = vmatprep.subr.bf16.mxu1 %v2291_v1 }
 0xf0b   :  { %v1050_v49 = vpop.f32.mrb[28].mxu1 }
 0xf0c   :  { %v2070_v29 = vpop.f32.mrb[29].mxu1 }
 0xf0d   :  { %v1053_v50 = vpop.f32.mrb[30].mxu1 }
 0xf0e   :  { %v2071_v51 = vpop.f32.mrb[31].mxu1 }
 0xf0f   :  { %v145_v51 = vadd.f32 %v2449_v45, %v2382_v8 }
 0xf10   :  { %v1125_v52 = vpop.f32.mrb[32].mxu0 }
 0xf11   :  { %v1126_v53 = vadd.f32 %v1125_v52, %v1050_v49  ;;  %v2078_v54 = vpop.f32.mrb[33].mxu0 }
 0xf12   :  { %v1128_v57 = vpop.f32.mrb[34].mxu0 }
 0xf13   :  { %v1131_v58 = vadd.f32 %v2476_v55, %v1126_v53  ;;  %v1191_v59 = vpop.f32.mrb[32].mxu1  ;;  %v2079_v60 = vpop.f32.mrb[35].mxu0 }
 0xf14   :  { %v1246_v61 = vadd.f32 %v1191_v59, %v140_v56  ;;  %v2086_v62 = vpop.f32.mrb[33].mxu1 }
 0xf15   :  { %v1850_v63 = vmul.f32 -1.442695, %v1131_v58  ;;  %v1194_v0 = vpop.f32.mrb[34].mxu1 }
 0xf16   :  { %v1853_v2 = vmul.f32 -1.442695, %v1246_v61  ;;  %v2087_v4 = vpop.f32.mrb[35].mxu1 }
 0xf17   :  { %2241 = vpow2.f32 %v1850_v63 }
 0xf18   :  { %2243 = vpow2.f32 %v1853_v2 }
 0xf21   :  { %v2242_v5 = vpop.eup %2241 }
 0xf22   :  { %v2244_v7 = vpop.eup %2243  ;;  %v1135_v10 = vadd.f32 1.0, %v2242_v5 }
 0xf23   :  { %v1250_v11 = vadd.f32 1.0, %v2244_v7 }
 0xf24   :  { %2245 = vrcp.f32 %v1135_v10 }
 0xf25   :  { %2247 = vrcp.f32 %v1250_v11 }
 0xf2e   :  { %v2246_v48 = vpop.eup %2245 }
 0xf2f   :  { %v2248_v13 = vpop.eup %2247  ;;  %v1138_v14 = vmul.f32 %v2246_v48, %v2391_v25 }
 0xf30   :  { %v1253_v15 = vmul.f32 %v2248_v13, %v2391_v25 }
 0xf31   :  { %v1139_v12 = vadd.f32 %v1138_v14, %v2394_v27 }
 0xf32   :  { %v1254_v16 = vadd.f32 %v1253_v15, %v2394_v27 }
 0xf33   :  { %1142 = vrot.lane.b32.xlu0 %v1139_v12, %s2295_s20  ;;  %v1140_v19 = vmul.f32 %v1139_v12, %v2619_v24 }
 0xf34   :  { %1257 = vrot.lane.b32.xlu1 %v1254_v16, %s2295_s20  ;;  %v1255_v20 = vmul.f32 %v1254_v16, %v2623_v31 }
 0xfa5   :  { %v1143_v46 = vpop.permute.xlu0 %1142 }
 0xfa6   :  { %v1258_v17 = vpop.permute.xlu1 %1257  ;;  %v1145_v18 = vmul.f32 %v1143_v46, %v1139_v12 }
 0xfa7   :  { %v1260_v9 = vmul.f32 %v1258_v17, %v1254_v16 }
 0xfa8   :  { %1147 = vrot.lane.b32.xlu0 %v1145_v18, %s2296_s21 }
 0xfa9   :  { %1262 = vrot.lane.b32.xlu1 %v1260_v9, %s2296_s21 }
0x101a   :  { %v1148_v21 = vpop.permute.xlu0 %1147 }
0x101b   :  { %v1263_v22 = vpop.permute.xlu1 %1262  ;;  %v2664_v23 = vadd.f32 %v1148_v21, %v1140_v19 }
0x101c   :  { %v2666_v26 = vadd.f32 %v1263_v22, %v1255_v20 }
0x101d   :  { %2249 = vtanh.f32 %v2664_v23 }
0x101e   :  { %2251 = vtanh.f32 %v2666_v26 }
0x1027   :  { %v2250_v28 = vpop.eup %2249 }
0x1028   :  { %v2252_v41 = vpop.eup %2251  ;;  %1153 = vrot.lane.b32.xlu0 %v2250_v28, %s2295_s20  ;;  %v2284_v28 = vld [vmem:[%s2802_s2 + $0x8] sm:$0xff]  }
0x1029   :  { %1268 = vrot.lane.b32.xlu1 %v2252_v41, %s2295_s20  ;;  %v2285_v41 = vld [vmem:[%s2805_s5] sm:$0xff]  }
0x109a   :  { %v1154_v34 = vpop.permute.xlu0 %1153 }
0x109b   :  { %v1269_v24 = vpop.permute.xlu1 %1268  ;;  %v1156_v32 = vmul.f32 %v1154_v34, %v1139_v12  ;;  %v2286_v34 = vld [vmem:[%s2806_s4] sm:$0xff]  }
0x109c   :  { %v1271_v31 = vmul.f32 %v1269_v24, %v1254_v16  ;;  %v2287_v24 = vld [vmem:[%s2805_s5 + $0x8] sm:$0xff]  }
0x109d   :  { %v1197_v33 = vpack.c.bf16 %v1156_v32, %v1156_v32  ;;  %v2288_v32 = vld [vmem:[%s2806_s4 + $0x8] sm:$0xff]  }
0x109e   :  { %v1272_v30 = vpack.c.bf16 %v1271_v31, %v1271_v31 }
0x109f   :  { %1199 = vrot.lane.b32.xlu0 %v1197_v33, %s2296_s21 }
0x10a0   :  { %1274 = vrot.lane.b32.xlu1 %v1272_v30, %s2296_s21 }
0x1111   :  { %v1200_v42 = vpop.permute.xlu0 %1199 }
0x1112   :  { %v1275_v35 = vpop.permute.xlu1 %1274  ;;  %2093 = vmatmul.mubr.msk.bf16.vlgmr.msra.gmra.mrb[36].mxu0 %vm191_vm6, %v1200_v42 }
0x1113   :  { %2101 = vmatmul.mubr.msk.bf16.vlgmr.msra.gmra.mrb[36].mxu1 %vm191_vm6, %v1275_v35  ;;  %2105 = vmatpush3.bf16.msra.mxu0 %v2357_v3 }
0x1114   :  { %2106 = vmatprep.subr.bf16.mxu0 %v2291_v1  ;;  %2108 = vmatprep.mubr.msk.bf16.mxu0 %vm2292_vm2, %v2291_v1 }
0x1115   :  { %2113 = vmatpush3.bf16.msra.mxu1 %v2412_v37  ;;  %2116 = vmatprep.mubr.msk.bf16.mxu1 %vm2292_vm2, %v2291_v1 }
0x1116   :  { %2114 = vmatprep.subr.bf16.mxu1 %v2291_v1 }
0x1117   :  { %2107 = vmatpush3.bf16.msra.mxu0 %v2372_v6 }
0x1118   :  { %2120 = vmatprep.subr.bf16.mxu0 %v2291_v1 }
0x1119   :  { %2115 = vmatpush3.bf16.msra.mxu1 %v2424_v39 }
0x111a   :  { %2109 = vmatmul.mubr.msk.bf16.vlgmr.msra.gmra.mrb[40].mxu0 %vm191_vm6, %v1275_v35  ;;  %2128 = vmatprep.subr.bf16.mxu1 %v2291_v1 }
0x111b   :  { %2121 = vmatpush3.bf16.msra.mxu0 %v2417_v38  ;;  %2124 = vmatprep.mubr.msk.bf16.mxu0 %vm2292_vm2, %v2291_v1 }
0x111c   :  { %2122 = vmatprep.subr.bf16.mxu0 %v2291_v1 }
0x111f   :  { %2123 = vmatpush3.bf16.msra.mxu0 %v2432_v40 }
0x1120   :  { %2136 = vmatprep.subr.bf16.mxu0 %v2291_v1 }
0x11e5   :  { %v1238_v3 = vpop.f32.mrb[36].mxu0 }
0x11e6   :  { %v1313_v6 = vpop.f32.mrb[36].mxu1  ;;  %v2094_v37 = vpop.f32.mrb[37].mxu0 }
0x11e7   :  { %v1314_v43 = vadd.f32 %v1313_v6, %v1238_v3  ;;  %v2102_v39 = vpop.f32.mrb[37].mxu1  ;;  %v1241_v36 = vpop.f32.mrb[38].mxu0  ;;  %v2289_v37 = vld [vmem:[%s2804_s3] ss:$0 sm:$0xff] }
0x11e8   :  { %v1316_v44 = vpop.f32.mrb[38].mxu1  ;;  %v2095_v49 = vpop.f32.mrb[39].mxu0 }
0x11e9   :  { %v1319_v29 = vadd.f32 %v2476_v55, %v1314_v43  ;;  %v2103_v38 = vpop.f32.mrb[39].mxu1  ;;  %v148_v43 = vadd.f32 %v2289_v37, %v2453_v47 }
0x11eb   :  { %v1855_v50 = vmul.f32 -1.442695, %v1319_v29 }
0x11ed   :  { %2253 = vpow2.f32 %v1855_v50  ;;  %v1379_v52 = vpop.f32.mrb[40].mxu0 }
0x11ee   :  { %v1434_v40 = vadd.f32 %v1379_v52, %v145_v51  ;;  %v2110_v53 = vpop.f32.mrb[41].mxu0 }
0x11ef   :  { %v1382_v54 = vpop.f32.mrb[42].mxu0 }
0x11f0   :  { %v1858_v56 = vmul.f32 -1.442695, %v1434_v40  ;;  %v2111_v57 = vpop.f32.mrb[43].mxu0 }
0x11f2   :  { %2255 = vpow2.f32 %v1858_v56 }
0x11f7   :  { %v2254_v58 = vpop.eup %2253 }
0x11f8   :  { %v1323_v59 = vadd.f32 1.0, %v2254_v58 }
0x11fa   :  { %2257 = vrcp.f32 %v1323_v59 }
0x11fc   :  { %v2256_v60 = vpop.eup %2255 }
0x11fd   :  { %v1438_v61 = vadd.f32 1.0, %v2256_v60 }
0x11ff   :  { %2259 = vrcp.f32 %v1438_v61 }
0x1204   :  { %v2258_v62 = vpop.eup %2257 }
0x1205   :  { %v1326_v63 = vmul.f32 %v2258_v62, %v2391_v25 }
0x1207   :  { %v1327_v0 = vadd.f32 %v1326_v63, %v2394_v27 }
0x1209   :  { %v2260_v8 = vpop.eup %2259  ;;  %1330 = vrot.lane.b32.xlu0 %v1327_v0, %s2295_s20  ;;  %v1328_v11 = vmul.f32 %v1327_v0, %v2664_v23  ;;  %v2283_v23 = vld [vmem:[%s2802_s2] sm:$0xff]  }
0x120a   :  { %v1441_v45 = vmul.f32 %v2260_v8, %v2391_v25 }
0x120c   :  { %v1442_v2 = vadd.f32 %v1441_v45, %v2394_v27 }
0x120e   :  { %1445 = vrot.lane.b32.xlu1 %v1442_v2, %s2295_s20  ;;  %v1443_v14 = vmul.f32 %v1442_v2, %v2666_v26 }
0x127b   :  { %v1331_v4 = vpop.permute.xlu0 %1330 }
0x127c   :  { %v1333_v5 = vmul.f32 %v1331_v4, %v1327_v0 }
0x127e   :  { %1335 = vrot.lane.b32.xlu0 %v1333_v5, %s2296_s21 }
0x1280   :  { %v1446_v7 = vpop.permute.xlu1 %1445 }
0x1281   :  { %v1448_v10 = vmul.f32 %v1446_v7, %v1442_v2 }
0x1283   :  { %1450 = vrot.lane.b32.xlu1 %v1448_v10, %s2296_s21 }
0x12f0   :  { %v1336_v48 = vpop.permute.xlu0 %1335 }
0x12f1   :  { %v2707_v13 = vadd.f32 %v1336_v48, %v1328_v11 }
0x12f3   :  { %2261 = vtanh.f32 %v2707_v13 }
0x12f5   :  { %v1451_v15 = vpop.permute.xlu1 %1450 }
0x12f6   :  { %v2711_v12 = vadd.f32 %v1451_v15, %v1443_v14 }
0x12f8   :  { %2263 = vtanh.f32 %v2711_v12 }
0x12fd   :  { %v2262_v16 = vpop.eup %2261 }
0x12fe   :  { %1341 = vrot.lane.b32.xlu0 %v2262_v16, %s2295_s20 }
0x1302   :  { %v2264_v46 = vpop.eup %2263 }
0x1303   :  { %1456 = vrot.lane.b32.xlu1 %v2264_v46, %s2295_s20 }
0x1370   :  { %v1342_v17 = vpop.permute.xlu0 %1341 }
0x1371   :  { %v1344_v18 = vmul.f32 %v1342_v17, %v1327_v0 }
0x1373   :  { %v1385_v9 = vpack.c.bf16 %v1344_v18, %v1344_v18 }
0x1375   :  { %1387 = vrot.lane.b32.xlu0 %v1385_v9, %s2296_s21  ;;  %v1457_v19 = vpop.permute.xlu1 %1456 }
0x1376   :  { %v1459_v20 = vmul.f32 %v1457_v19, %v1442_v2 }
0x1378   :  { %v1460_v21 = vpack.c.bf16 %v1459_v20, %v1459_v20 }
0x137a   :  { %1462 = vrot.lane.b32.xlu1 %v1460_v21, %s2296_s21 }
0x13e7   :  { %v1388_v22 = vpop.permute.xlu0 %1387 }
0x13e8   :  { %2117 = vmatmul.mubr.msk.bf16.vlgmr.msra.gmra.mrb[40].mxu1 %vm191_vm6, %v1388_v22 }
0x13e9   :  { %2129 = vmatpush3.bf16.msra.mxu1 %v2283_v23  ;;  %2132 = vmatprep.mubr.msk.bf16.mxu1 %vm2292_vm2, %v2291_v1 }
0x13ea   :  { %2130 = vmatprep.subr.bf16.mxu1 %v2291_v1 }
0x13ec   :  { %v1463_v26 = vpop.permute.xlu1 %1462 }
0x13ed   :  { %2131 = vmatpush3.bf16.msra.mxu1 %v2284_v28  ;;  %2125 = vmatmul.mubr.msk.bf16.vlgmr.msra.gmra.mrb[44].mxu0 %vm191_vm6, %v1463_v26 }
0x13ee   :  { %2144 = vmatprep.subr.bf16.mxu1 %v2291_v1  ;;  %2137 = vmatpush3.bf16.msra.mxu0 %v2285_v41  ;;  %v2290_v41 = vld [vmem:[%s2807_s6] ss:$0 sm:$0xff] }
0x13ef   :  { %2138 = vmatprep.subr.bf16.mxu0 %v2291_v1  ;;  %2140 = vmatprep.mubr.msk.bf16.mxu0 %vm2292_vm2, %v2291_v1 }
0x13f0   :  { %2133 = vmatmul.mubr.msk.bf16.vlgmr.msra.gmra.mrb[44].mxu1 %vm191_vm6, %v1463_v26 }
0x13f1   :  { %2145 = vmatpush3.bf16.msra.mxu1 %v2286_v34  ;;  %2148 = vmatprep.mubr.msk.bf16.mxu1 %vm2292_vm2, %v2291_v1 }
0x13f2   :  { %2146 = vmatprep.subr.bf16.mxu1 %v2291_v1  ;;  %2139 = vmatpush3.bf16.msra.mxu0 %v2287_v24 }
0x13f5   :  { %2147 = vmatpush3.bf16.msra.mxu1 %v2288_v32 }
0x14bb   :  { %v1426_v31 = vpop.f32.mrb[40].mxu1 }
0x14bc   :  { %v2118_v33 = vpop.f32.mrb[41].mxu1 }
0x14bd   :  { %v1429_v30 = vpop.f32.mrb[42].mxu1 }
0x14be   :  { %v2119_v42 = vpop.f32.mrb[43].mxu1 }
0x14c0   :  { %v1501_v35 = vpop.f32.mrb[44].mxu0 }
0x14c1   :  { %v1502_v3 = vadd.f32 %v1501_v35, %v1426_v31  ;;  %v2126_v6 = vpop.f32.mrb[45].mxu0 }
0x14c2   :  { %v1504_v39 = vpop.f32.mrb[46].mxu0 }
0x14c3   :  { %v1507_v36 = vadd.f32 %v2476_v55, %v1502_v3  ;;  %v1567_v44 = vpop.f32.mrb[44].mxu1  ;;  %v2127_v49 = vpop.f32.mrb[47].mxu0  ;;  %v2297_v39 = vmov 0.0|0.0  }
0x14c4   :  { %v1622_v29 = vadd.f32 %v1567_v44, %v148_v43  ;;  %v2134_v38 = vpop.f32.mrb[45].mxu1  ;;  %2163 = vmatprep.subr.bf16.mxu0 %v2297_v39  ;;  %v1724_v49 = vld [vmem:[%s2808_s7 + $0x18] sm:$0xff] }
0x14c5   :  { %v1860_v50 = vmul.f32 -1.442695, %v1507_v36  ;;  %v1570_v51 = vpop.f32.mrb[46].mxu1  ;;  %v1721_v36 = vld [vmem:[%s2808_s7] sm:$0xff] }
0x14c6   :  { %v1863_v52 = vmul.f32 -1.442695, %v1622_v29  ;;  %v2135_v40 = vpop.f32.mrb[47].mxu1 }
0x14c7   :  { %2265 = vpow2.f32 %v1860_v50  ;;  %v1866_v40 = vld [vmem:[%s2809_s8] ss:$0 sm:$0xff] }
0x14c8   :  { %2267 = vpow2.f32 %v1863_v52 }
0x14d1   :  { %v2266_v53 = vpop.eup %2265 }
0x14d2   :  { %v2268_v54 = vpop.eup %2267  ;;  %v1511_v56 = vadd.f32 1.0, %v2266_v53 }
0x14d3   :  { %v1626_v57 = vadd.f32 1.0, %v2268_v54 }
0x14d4   :  { %2269 = vrcp.f32 %v1511_v56 }
0x14d5   :  { %2271 = vrcp.f32 %v1626_v57 }
0x14de   :  { %v2270_v47 = vpop.eup %2269 }
0x14df   :  { %v2272_v58 = vpop.eup %2271  ;;  %v1514_v55 = vmul.f32 %v2270_v47, %v2391_v25 }
0x14e0   :  { %v1629_v59 = vmul.f32 %v2272_v58, %v2391_v25 }
0x14e1   :  { %v1515_v60 = vadd.f32 %v1514_v55, %v2394_v27 }
0x14e2   :  { %v1630_v61 = vadd.f32 %v1629_v59, %v2394_v27 }
0x14e3   :  { %1518 = vrot.lane.b32.xlu0 %v1515_v60, %s2295_s20  ;;  %v1516_v45 = vmul.f32 %v1515_v60, %v2707_v13 }
0x14e4   :  { %1633 = vrot.lane.b32.xlu1 %v1630_v61, %s2295_s20  ;;  %v1631_v2 = vmul.f32 %v1630_v61, %v2711_v12 }
0x1555   :  { %v1519_v62 = vpop.permute.xlu0 %1518 }
0x1556   :  { %v1634_v63 = vpop.permute.xlu1 %1633  ;;  %v1521_v0 = vmul.f32 %v1519_v62, %v1515_v60 }
0x1557   :  { %v1636_v8 = vmul.f32 %v1634_v63, %v1630_v61 }
0x1558   :  { %1523 = vrot.lane.b32.xlu0 %v1521_v0, %s2296_s21 }
0x1559   :  { %1638 = vrot.lane.b32.xlu1 %v1636_v8, %s2296_s21 }
0x15ca   :  { %v1524_v4 = vpop.permute.xlu0 %1523 }
0x15cb   :  { %v1639_v5 = vpop.permute.xlu1 %1638  ;;  %v1526_v7 = vadd.f32 %v1524_v4, %v1516_v45 }
0x15cc   :  { %v1641_v10 = vadd.f32 %v1639_v5, %v1631_v2 }
0x15cd   :  { %2273 = vtanh.f32 %v1526_v7 }
0x15ce   :  { %2275 = vtanh.f32 %v1641_v10 }
0x15d7   :  { %v2274_v11 = vpop.eup %2273 }
0x15d8   :  { %v2276_v48 = vpop.eup %2275  ;;  %1529 = vrot.lane.b32.xlu0 %v2274_v11, %s2295_s20 }
0x15d9   :  { %1644 = vrot.lane.b32.xlu1 %v2276_v48, %s2295_s20 }
0x164a   :  { %v1530_v14 = vpop.permute.xlu0 %1529 }
0x164b   :  { %v1645_v15 = vpop.permute.xlu1 %1644  ;;  %v1532_v16 = vmul.f32 %v1530_v14, %v1515_v60 }
0x164c   :  { %v1647_v46 = vmul.f32 %v1645_v15, %v1630_v61 }
0x164d   :  { %v1573_v17 = vpack.c.bf16 %v1532_v16, %v1532_v16 }
0x164e   :  { %v1648_v13 = vpack.c.bf16 %v1647_v46, %v1647_v46 }
0x164f   :  { %1575 = vrot.lane.b32.xlu0 %v1573_v17, %s2296_s21 }
0x1650   :  { %1650 = vrot.lane.b32.xlu1 %v1648_v13, %s2296_s21 }
0x16c1   :  { %v1576_v12 = vpop.permute.xlu0 %1575 }
0x16c2   :  { %v1651_v18 = vpop.permute.xlu1 %1650  ;;  %2141 = vmatmul.mubr.msk.bf16.vlgmr.msra.gmra.mrb[48].mxu0 %vm191_vm6, %v1576_v12 }
0x16c3   :  { %2149 = vmatmul.mubr.msk.bf16.vlgmr.msra.gmra.mrb[48].mxu1 %vm191_vm6, %v1651_v18  ;;  %2160 = vmatprep.mubr.msk.f32.mxu0 %vm2292_vm2, %v2291_v1 }
0x1795   :  { %v1614_v9 = vpop.f32.mrb[48].mxu0 }
0x1796   :  { %v1689_v19 = vpop.f32.mrb[48].mxu1  ;;  %v2142_v20 = vpop.f32.mrb[49].mxu0 }
0x1797   :  { %v1690_v21 = vadd.f32 %v1689_v19, %v1614_v9  ;;  %v2150_v22 = vpop.f32.mrb[49].mxu1  ;;  %v1617_v23 = vpop.f32.mrb[50].mxu0 }
0x1798   :  { %v1692_v26 = vpop.f32.mrb[50].mxu1  ;;  %v2143_v28 = vpop.f32.mrb[51].mxu0 }
0x1799   :  { %v1695_v34 = vadd.f32 %v2290_v41, %v1690_v21  ;;  %v2151_v24 = vpop.f32.mrb[51].mxu1 }
0x179b   :  { %v1865_v32 = vmul.f32 -1.442695, %v1695_v34 }
0x179d   :  { %2277 = vpow2.f32 %v1865_v32 }
0x17a7   :  { %v2278_v31 = vpop.eup %2277 }
0x17a8   :  { %v1699_v33 = vadd.f32 1.0, %v2278_v31 }
0x17aa   :  { %2279 = vrcp.f32 %v1699_v33 }
0x17b4   :  { %v2280_v1 = vpop.eup %2279 }
0x17b5   :  { %v1702_v30 = vmul.f32 %v2280_v1, %v2391_v25  ;;  %v1722_v25 = vld [vmem:[%s2808_s7 + $0x8] sm:$0xff] }
0x17b6   :  { %v2164_v44 = vpack.c.bf16 %v1722_v25, %v1721_v36 }
0x17b7   :  { %v1703_v42 = vadd.f32 %v1702_v30, %v2394_v27  ;;  %v1723_v27 = vld [vmem:[%s2808_s7 + $0x10] sm:$0xff] }
0x17b8   :  { %2165 = vmatpush3.bf16.msra.mxu0 %v2164_v44  ;;  %v2167_v29 = vpack.c.bf16 %v1724_v49, %v1723_v27 }
0x17b9   :  { %1706 = vrot.lane.b32.xlu0 %v1703_v42, %s2295_s20  ;;  %v1704_v6 = vmul.f32 %v1703_v42, %v1526_v7  ;;  %2166 = vmatprep.subr.bf16.mxu0 %v2297_v39 }
0x17bc   :  { %2168 = vmatpush3.bf16.msra.mxu0 %v2167_v29 }
0x182b   :  { %v1707_v35 = vpop.permute.xlu0 %1706 }
0x182c   :  { %v1709_v3 = vmul.f32 %v1707_v35, %v1703_v42 }
0x182e   :  { %1711 = vrot.lane.b32.xlu1 %v1709_v3, %s2296_s21 }
0x18a0   :  { %v1712_v37 = vpop.permute.xlu1 %1711 }
0x18a1   :  { %v1714_v43 = vadd.f32 %v1712_v37, %v1704_v6 }
0x18a3   :  { %2281 = vtanh.f32 %v1714_v43 }
0x18ad   :  { %v2282_v38 = vpop.eup %2281 }
0x18ae   :  { %1717 = vrot.lane.b32.xlu0 %v2282_v38, %s2295_s20 }
0x1920   :  { %v1718_v50 = vpop.permute.xlu0 %1717 }
0x1921   :  { %v1720_v51 = vmul.f32 %v1718_v50, %v1703_v42 }
0x1923   :  { %1733 = vrot.lane.b32.xlu1 %v1720_v51, %s2296_s21 }
0x1995   :  { %v1734_v52 = vpop.permute.xlu1 %1733 }
0x1996   :  { %2161 = vmatmul.mubr.msk.f32.vlgmr.msra.gmra.mrb[52].mxu0 %vm191_vm6, %v1734_v52 }
0x1a69   :  { %v1803_v53 = vpop.f32.mrb[52].mxu0 }
0x1a6a   :  { %v1804_v54 = vadd.f32 %v1866_v40, %v1803_v53  ;;  %v2162_v56 = vpop.f32.mrb[53].mxu0 }
0x1a6c   :  { %1807 = vst.msk [vmem:[%s2810_s9] sm:$0xff] %vm69_vm1, %v1804_v54 }

</bundles_post_ra>
